<compile_context>
chip_gen: v7x
topology: tpu7x:2x2x1
jax: 0.10.0
libtpu: 0.0.40
codegen_flags: <defaults>
</compile_context>

<pallas_src>
import jax
import jax.numpy as jnp
from jax.experimental import pallas as pl
from jax.experimental.pallas import tpu as pltpu

# ----------------------------- configuration -------------------------------
B, S, H = 2, 8, 32            # batch, sequence, hidden
NH, HD = 2, 16                # heads, head dim (NH * HD == H)
I = 64                        # FFN intermediate size
VOCAB, MAXPOS, TYPES = 100, 16, 2
NLAYERS = 2
LIWC_DIM = 16                 # liwc_features_dim
LIWC_HIDDEN = 128             # liwc_processor output size (from the module)
NUM_LABELS = 2                # BERT classification head
LANE = 128                    # TPU lane width

# lane-aligned per-layer param table: one field per 128-lane row (lane 0 start)
ROW_BQKV, ROW_BO, ROW_B1, ROW_B2, ROW_G1, ROW_BE1, ROW_G2, ROW_BE2 = range(8)
# lane-aligned head param table rows
ROW_BP, ROW_BC, ROW_BL, ROW_WE_LOG, ROW_WE_LIWC, ROW_BE = range(6)


# ------------------------------ kernel helpers ------------------------------
def _layernorm(x, g, b, eps=1e-12):
    mu = jnp.mean(x, axis=-1, keepdims=True)
    var = jnp.mean((x - mu) ** 2, axis=-1, keepdims=True)
    return (x - mu) * jax.lax.rsqrt(var + eps) * g + b


# --------------------------- fused Pallas kernel ----------------------------
def fused_bert_liwc_kernel(ids_ref, mask_ref, liwc_ref,
                           wemb_ref, postype_ref, embln_ref,
                           wqkv_ref, wo_ref, w1_ref, w2_ref, lmat_ref,
                           wp_ref, wc_ref, wl_ref, hmat_ref,
                           out_ref):
    scale = 1.0 / (float(HD) ** 0.5)

    # ---- embedding lookup fused in-kernel (one-hot matmul gather) ----
    ids = ids_ref[...]                                              # (B*S, 1) int32
    iota = jax.lax.broadcasted_iota(jnp.int32, (B * S, VOCAB), 1)
    onehot = jnp.where(ids == iota, 1.0, 0.0).astype(jnp.bfloat16)  # (B*S, VOCAB)
    word = jnp.dot(onehot, wemb_ref[...], preferred_element_type=jnp.float32)
    emb = word + postype_ref[...]                                   # + pos + type-0 emb
    x = _layernorm(emb, embln_ref[0:1, :], embln_ref[1:2, :])       # (B*S, H) f32

    # ---- additive attention-mask bias, computed in-kernel ----
    mbias = (1.0 - mask_ref[...]) * (-1e9)                          # (B, S)

    for l in range(NLAYERS):                                        # static layer loop
        lm = lmat_ref[l]                                            # (8, 128) f32, lane-0 aligned
        bqkv = lm[ROW_BQKV:ROW_BQKV + 1, 0:3 * H]
        bo = lm[ROW_BO:ROW_BO + 1, 0:H]
        b1 = lm[ROW_B1:ROW_B1 + 1, 0:I]
        b2 = lm[ROW_B2:ROW_B2 + 1, 0:H]
        g1 = lm[ROW_G1:ROW_G1 + 1, 0:H]
        be1 = lm[ROW_BE1:ROW_BE1 + 1, 0:H]
        g2 = lm[ROW_G2:ROW_G2 + 1, 0:H]
        be2 = lm[ROW_BE2:ROW_BE2 + 1, 0:H]

        # Fused QKV projection: one (B*S, H) @ (H, 3H) bf16 matmul.
        x_bf = x.astype(jnp.bfloat16)
        qkv = jnp.dot(x_bf, wqkv_ref[l], preferred_element_type=jnp.float32) + bqkv

        # Fold heads into the leading (batch) dim -> exactly two batched
        # einsums for the attention core (no lane concatenate).
        q3 = jnp.concatenate(
            [qkv[:, h * HD:(h + 1) * HD].reshape(B, S, HD) for h in range(NH)], axis=0)
        k3 = jnp.concatenate(
            [qkv[:, H + h * HD:H + (h + 1) * HD].reshape(B, S, HD) for h in range(NH)], axis=0)
        v3 = jnp.concatenate(
            [qkv[:, 2 * H + h * HD:2 * H + (h + 1) * HD].reshape(B, S, HD) for h in range(NH)],
            axis=0)
        q3 = q3.astype(jnp.bfloat16)
        k3 = k3.astype(jnp.bfloat16)
        v3 = v3.astype(jnp.bfloat16)

        s3 = jnp.einsum('bqd,bkd->bqk', q3, k3,
                        preferred_element_type=jnp.float32) * scale   # (NH*B, S, S)
        s4 = s3.reshape(NH, B, S, S) + mbias[None, :, None, :]
        s4 = s4 - jnp.max(s4, axis=-1, keepdims=True)
        p4 = jnp.exp(s4)
        p4 = p4 * pl.reciprocal(jnp.sum(p4, axis=-1, keepdims=True), approx=True)
        p3 = p4.reshape(NH * B, S, S).astype(jnp.bfloat16)
        ctx3 = jnp.einsum('bqk,bkd->bqd', p3, v3,
                          preferred_element_type=jnp.float32)          # (NH*B, S, HD)

        # Output projection as a sum of per-head dots (avoids lane concat).
        wo_l = wo_ref[l]                                               # (NH, HD, H)
        attn = bo
        for h in range(NH):
            ctx_h = ctx3[h * B:(h + 1) * B].reshape(B * S, HD).astype(jnp.bfloat16)
            attn = attn + jnp.dot(ctx_h, wo_l[h], preferred_element_type=jnp.float32)
        x = _layernorm(x + attn, g1, be1)

        # FFN.
        x_bf = x.astype(jnp.bfloat16)
        hdn = jnp.dot(x_bf, w1_ref[l], preferred_element_type=jnp.float32) + b1
        hdn = jax.nn.gelu(hdn, approximate=True)   # TODO(synk): HF BERT uses erf-GELU
        ffn = jnp.dot(hdn.astype(jnp.bfloat16), w2_ref[l],
                      preferred_element_type=jnp.float32) + b2
        x = _layernorm(x + ffn, g2, be2)

    # ---- pooler / classifier / LIWC head ----
    hm = hmat_ref[...]                                                 # (8, 128) f32
    cls = x.reshape(B, S, H)[:, 0, :]                                  # (B, H) [CLS] rows
    pooled = jnp.tanh(
        jnp.dot(cls.astype(jnp.bfloat16), wp_ref[...],
                preferred_element_type=jnp.float32) + hm[ROW_BP:ROW_BP + 1, 0:H])
    logits = jnp.dot(pooled.astype(jnp.bfloat16), wc_ref[...],
                     preferred_element_type=jnp.float32) + hm[ROW_BC:ROW_BC + 1, 0:NUM_LABELS]
    liwc_out = jnp.dot(liwc_ref[...], wl_ref[...],
                       preferred_element_type=jnp.float32) + hm[ROW_BL:ROW_BL + 1, 0:LIWC_HIDDEN]
    # extra_classifier(concat([logits, liwc_out], dim=1)) as a split dot product
    # (avoids an in-kernel lane concatenation).
    final = (jnp.sum(logits * hm[ROW_WE_LOG:ROW_WE_LOG + 1, 0:NUM_LABELS],
                     axis=-1, keepdims=True)
             + jnp.sum(liwc_out * hm[ROW_WE_LIWC:ROW_WE_LIWC + 1, 0:LIWC_HIDDEN],
                       axis=-1, keepdims=True)
             + hm[ROW_BE:ROW_BE + 1, 0:1])                             # (B, 1)

    # Lane-dense output: broadcast the per-row logit across all 128 lanes;
    # the wrapper slices lane 0.
    out_ref[...] = jnp.broadcast_to(final, (B, LANE))


# ------------------------------- full forward --------------------------------
_ARG_KEYS = ('word_emb', 'pos_type', 'emb_ln', 'wqkv', 'wo', 'w1', 'w2',
             'lmat', 'wp', 'wc', 'wl', 'hmat')


def bert_with_liwc_forward(params, input_ids, attention_mask, liwc_features, labels=None):
    ids = input_ids.reshape(B * S, 1).astype(jnp.int32)
    mask = attention_mask.reshape(B, S).astype(jnp.float32)
    liwc = liwc_features.astype(jnp.bfloat16)

    args = [ids, mask, liwc] + [params[k] for k in _ARG_KEYS]

    # Advisory cost estimate for the XLA scheduler.
    flops_layer = (2 * B * S * H * 3 * H          # fused QKV
                   + 4 * NH * B * S * S * HD      # scores + context
                   + 2 * B * S * H * H            # output projection
                   + 4 * B * S * H * I)           # FFN up + down
    flops = (2 * B * S * VOCAB * H                # one-hot embedding gather matmul
             + NLAYERS * flops_layer
             + 2 * B * H * (H + NUM_LABELS)
             + 2 * B * LIWC_DIM * LIWC_HIDDEN
             + 2 * B * (NUM_LABELS + LIWC_HIDDEN))
    transcendentals = NLAYERS * B * (NH * S * S + S * I) + B * H
    bytes_accessed = (sum(int(a.size) * a.dtype.itemsize for a in args)
                      + B * LANE * 4)

    vmem_spec = pl.BlockSpec(memory_space=pltpu.MemorySpace.VMEM)

    out = pl.pallas_call(
        fused_bert_liwc_kernel,
        out_shape=jax.ShapeDtypeStruct((B, LANE), jnp.float32),
        in_specs=[vmem_spec] * len(args),
        out_specs=vmem_spec,
        compiler_params=pltpu.CompilerParams(vmem_limit_bytes=8 * 1024 * 1024),
        cost_estimate=pl.CostEstimate(flops=flops,
                                      transcendentals=transcendentals,
                                      bytes_accessed=bytes_accessed),
    )(*args)

    final_logits = out[:, 0]                       # squeeze(-1) equivalent

    if labels is not None:
        # BCEWithLogitsLoss (mean reduction) — plain-JAX glue.
        z = final_logits
        y = labels.astype(jnp.float32)
        loss = jnp.mean(jnp.maximum(z, 0.0) - z * y + jnp.log1p(jnp.exp(-jnp.abs(z))))
        return {'loss': loss, 'logits': final_logits}
    return {'logits': final_logits}


# ------------------------------ deterministic init ---------------------------
def init_params(key):
    keys = jax.random.split(key, 12)
    f32, bf16 = jnp.float32, jnp.bfloat16

    def dense(k, shape, dtype=bf16):
        return (0.02 * jax.random.normal(k, shape, f32)).astype(dtype)

    word_emb = dense(keys[0], (VOCAB, H))                       # bf16 table
    pos_emb = dense(keys[1], (MAXPOS, H), f32)
    type_emb = dense(keys[2], (TYPES, H), f32)
    # position + token-type-0 embeddings, pre-tiled over the batch (param-only).
    pos_type = jnp.tile(pos_emb[:S] + type_emb[0:1], (B, 1))    # (B*S, H) f32

    emb_ln = jnp.concatenate([jnp.ones((1, H), f32), jnp.zeros((1, H), f32)], axis=0)

    # Lane-aligned per-layer bias / LayerNorm table (one field per 128-lane row).
    gamma_row = jnp.concatenate([jnp.ones((1, H), f32),
                                 jnp.zeros((1, LANE - H), f32)], axis=-1)
    zero_row = jnp.zeros((1, LANE), f32)
    lmat_rows = [zero_row, zero_row, zero_row, zero_row,        # bqkv | bo | b1 | b2
                 gamma_row, zero_row, gamma_row, zero_row]      # g1 | be1 | g2 | be2
    lmat = jnp.tile(jnp.concatenate(lmat_rows, axis=0)[None], (NLAYERS, 1, 1))

    # Lane-aligned head table: bp | bc | bl | we_logits | we_liwc | be | pad | pad.
    we = 0.02 * jax.random.normal(keys[3], (1, NUM_LABELS + LIWC_HIDDEN), f32)
    we_log_row = jnp.concatenate([we[:, :NUM_LABELS],
                                  jnp.zeros((1, LANE - NUM_LABELS), f32)], axis=-1)
    we_liwc_row = we[:, NUM_LABELS:]                            # (1, 128)
    hmat = jnp.concatenate([jnp.zeros((3, LANE), f32), we_log_row, we_liwc_row,
                            jnp.zeros((3, LANE), f32)], axis=0)  # (8, 128)

    return {
        'word_emb': word_emb,                                   # (VOCAB, H) bf16
        'pos_type': pos_type,                                   # (B*S, H) f32
        'emb_ln': emb_ln,                                       # (2, H) f32
        'wqkv': dense(keys[4], (NLAYERS, H, 3 * H)),            # fused [wq|wk|wv] bf16
        'wo': dense(keys[5], (NLAYERS, NH, HD, H)),             # per-head out proj bf16
        'w1': dense(keys[6], (NLAYERS, H, I)),
        'w2': dense(keys[7], (NLAYERS, I, H)),
        'lmat': lmat,                                           # (NLAYERS, 8, 128) f32
        'wp': dense(keys[8], (H, H)),
        'wc': dense(keys[9], (H, NUM_LABELS)),
        'wl': dense(keys[10], (LIWC_DIM, LIWC_HIDDEN)),
        'hmat': hmat,                                           # (8, 128) f32
    }


# ------------------------------------ main ------------------------------------
if __name__ == "__main__":
    root = jax.random.PRNGKey(0)
    k_params, k_ids, k_liwc = jax.random.split(root, 3)

    params = init_params(k_params)
    input_ids = jax.random.randint(k_ids, (B, S), 0, VOCAB, dtype=jnp.int32)
    attention_mask = jnp.ones((B, S), jnp.float32)
    liwc_features = jax.random.normal(k_liwc, (B, LIWC_DIM), jnp.float32)

    out = bert_with_liwc_forward(params, input_ids, attention_mask, liwc_features)
    out = jax.block_until_ready(out)
    assert out['logits'].shape == (B,)
    print("KERNEL_OK")
</pallas_src>

<mosaic_0001>
module attributes {stable_mosaic.version = 11 : i64} {
  func.func @fused_bert_liwc_kernel(%arg0: memref<16x1xi32, #tpu.memory_space<vmem>>, %arg1: memref<2x8xf32, #tpu.memory_space<vmem>>, %arg2: memref<2x16xbf16, #tpu.memory_space<vmem>>, %arg3: memref<100x32xbf16, #tpu.memory_space<vmem>>, %arg4: memref<16x32xf32, #tpu.memory_space<vmem>>, %arg5: memref<2x32xf32, #tpu.memory_space<vmem>>, %arg6: memref<2x32x96xbf16, #tpu.memory_space<vmem>>, %arg7: memref<2x2x16x32xbf16, #tpu.memory_space<vmem>>, %arg8: memref<2x32x64xbf16, #tpu.memory_space<vmem>>, %arg9: memref<2x64x32xbf16, #tpu.memory_space<vmem>>, %arg10: memref<2x8x128xf32, #tpu.memory_space<vmem>>, %arg11: memref<32x32xbf16, #tpu.memory_space<vmem>>, %arg12: memref<32x2xbf16, #tpu.memory_space<vmem>>, %arg13: memref<16x128xbf16, #tpu.memory_space<vmem>>, %arg14: memref<8x128xf32, #tpu.memory_space<vmem>>, %arg15: memref<2x128xf32, #tpu.memory_space<vmem>>) attributes {dimension_semantics = [], scalar_prefetch = 0 : i64, scratch_operands = 0 : i64, tpu.core_type = #tpu.core_type<tc>} {
    %c0 = arith.constant 0 : index
    %c0_0 = arith.constant 0 : index
    %0 = vector.load %arg0[%c0, %c0_0] : memref<16x1xi32, #tpu.memory_space<vmem>>, vector<16x1xi32>
    %1 = tpu.iota {dimensions = array<i32: 1>} : vector<16x100xi32>
    %2 = vector.broadcast %0 : vector<16x1xi32> to vector<16x100xi32>
    %3 = arith.cmpi eq, %2, %1 : vector<16x100xi32>
    %cst = arith.constant 1.000000e+00 : f32
    %cst_1 = arith.constant 0.000000e+00 : f32
    %4 = vector.broadcast %cst : f32 to vector<16x100xf32>
    %5 = vector.broadcast %cst_1 : f32 to vector<16x100xf32>
    %6 = arith.select %3, %4, %5 : vector<16x100xi1>, vector<16x100xf32>
    %7 = arith.truncf %6 : vector<16x100xf32> to vector<16x100xbf16>
    %c0_2 = arith.constant 0 : index
    %c0_3 = arith.constant 0 : index
    %8 = vector.load %arg3[%c0_2, %c0_3] : memref<100x32xbf16, #tpu.memory_space<vmem>>, vector<100x32xbf16>
    %cst_4 = arith.constant dense<0.000000e+00> : vector<16x32xf32>
    %9 = tpu.matmul %7, %8, %cst_4 {dimension_numbers = #tpu.dot_dimension_numbers<[1], [0], [0], [1], [0, 0, 1, 1], [], []>} : vector<16x100xbf16>, vector<100x32xbf16>, vector<16x32xf32> -> vector<16x32xf32>
    %c0_5 = arith.constant 0 : index
    %c0_6 = arith.constant 0 : index
    %10 = vector.load %arg4[%c0_5, %c0_6] : memref<16x32xf32, #tpu.memory_space<vmem>>, vector<16x32xf32>
    %11 = arith.addf %9, %10 : vector<16x32xf32>
    %c0_7 = arith.constant 0 : index
    %c0_8 = arith.constant 0 : index
    %12 = vector.load %arg5[%c0_7, %c0_8] : memref<2x32xf32, #tpu.memory_space<vmem>>, vector<1x32xf32>
    %c1 = arith.constant 1 : index
    %c0_9 = arith.constant 0 : index
    %13 = vector.load %arg5[%c1, %c0_9] : memref<2x32xf32, #tpu.memory_space<vmem>>, vector<1x32xf32>
    %cst_10 = arith.constant dense<0.000000e+00> : vector<16xf32>
    %14 = vector.multi_reduction <add>, %11, %cst_10 [1] : vector<16x32xf32> to vector<16xf32>
    %15 = vector.shape_cast %14 : vector<16xf32> to vector<16x1xf32>
    %cst_11 = arith.constant 3.200000e+01 : f32
    %16 = vector.broadcast %cst_11 : f32 to vector<16x1xf32>
    %17 = arith.divf %15, %16 : vector<16x1xf32>
    %18 = vector.broadcast %17 : vector<16x1xf32> to vector<16x32xf32>
    %19 = arith.subf %11, %18 : vector<16x32xf32>
    %20 = arith.mulf %19, %19 : vector<16x32xf32>
    %cst_12 = arith.constant dense<0.000000e+00> : vector<16xf32>
    %21 = vector.multi_reduction <add>, %20, %cst_12 [1] : vector<16x32xf32> to vector<16xf32>
    %22 = vector.shape_cast %21 : vector<16xf32> to vector<16x1xf32>
    %cst_13 = arith.constant 3.200000e+01 : f32
    %23 = vector.broadcast %cst_13 : f32 to vector<16x1xf32>
    %24 = arith.divf %22, %23 : vector<16x1xf32>
    %25 = vector.broadcast %17 : vector<16x1xf32> to vector<16x32xf32>
    %26 = arith.subf %11, %25 : vector<16x32xf32>
    %cst_14 = arith.constant 9.99999996E-13 : f32
    %27 = vector.broadcast %cst_14 : f32 to vector<16x1xf32>
    %28 = arith.addf %24, %27 : vector<16x1xf32>
    %29 = math.rsqrt %28 : vector<16x1xf32>
    %30 = vector.broadcast %29 : vector<16x1xf32> to vector<16x32xf32>
    %31 = arith.mulf %26, %30 : vector<16x32xf32>
    %32 = vector.broadcast %12 : vector<1x32xf32> to vector<16x32xf32>
    %33 = arith.mulf %31, %32 : vector<16x32xf32>
    %34 = vector.broadcast %13 : vector<1x32xf32> to vector<16x32xf32>
    %35 = arith.addf %33, %34 : vector<16x32xf32>
    %c0_15 = arith.constant 0 : index
    %c0_16 = arith.constant 0 : index
    %36 = vector.load %arg1[%c0_15, %c0_16] : memref<2x8xf32, #tpu.memory_space<vmem>>, vector<2x8xf32>
    %cst_17 = arith.constant 1.000000e+00 : f32
    %37 = vector.broadcast %cst_17 : f32 to vector<2x8xf32>
    %38 = arith.subf %37, %36 : vector<2x8xf32>
    %cst_18 = arith.constant -1.000000e+09 : f32
    %39 = vector.broadcast %cst_18 : f32 to vector<2x8xf32>
    %40 = arith.mulf %38, %39 : vector<2x8xf32>
    %c0_19 = arith.constant 0 : index
    %c0_20 = arith.constant 0 : index
    %c0_21 = arith.constant 0 : index
    %41 = vector.load %arg10[%c0_19, %c0_20, %c0_21] : memref<2x8x128xf32, #tpu.memory_space<vmem>>, vector<1x8x128xf32>
    %42 = vector.shape_cast %41 : vector<1x8x128xf32> to vector<8x128xf32>
    %43 = vector.extract_strided_slice %42 {offsets = [0, 0], sizes = [1, 96], strides = [1, 1]} : vector<8x128xf32> to vector<1x96xf32>
    %44 = vector.extract_strided_slice %42 {offsets = [1, 0], sizes = [1, 32], strides = [1, 1]} : vector<8x128xf32> to vector<1x32xf32>
    %45 = vector.extract_strided_slice %42 {offsets = [2, 0], sizes = [1, 64], strides = [1, 1]} : vector<8x128xf32> to vector<1x64xf32>
    %46 = vector.extract_strided_slice %42 {offsets = [3, 0], sizes = [1, 32], strides = [1, 1]} : vector<8x128xf32> to vector<1x32xf32>
    %47 = vector.extract_strided_slice %42 {offsets = [4, 0], sizes = [1, 32], strides = [1, 1]} : vector<8x128xf32> to vector<1x32xf32>
    %48 = vector.extract_strided_slice %42 {offsets = [5, 0], sizes = [1, 32], strides = [1, 1]} : vector<8x128xf32> to vector<1x32xf32>
    %49 = vector.extract_strided_slice %42 {offsets = [6, 0], sizes = [1, 32], strides = [1, 1]} : vector<8x128xf32> to vector<1x32xf32>
    %50 = vector.extract_strided_slice %42 {offsets = [7, 0], sizes = [1, 32], strides = [1, 1]} : vector<8x128xf32> to vector<1x32xf32>
    %51 = arith.truncf %35 : vector<16x32xf32> to vector<16x32xbf16>
    %c0_22 = arith.constant 0 : index
    %c0_23 = arith.constant 0 : index
    %c0_24 = arith.constant 0 : index
    %52 = vector.load %arg6[%c0_22, %c0_23, %c0_24] : memref<2x32x96xbf16, #tpu.memory_space<vmem>>, vector<1x32x96xbf16>
    %53 = vector.shape_cast %52 : vector<1x32x96xbf16> to vector<32x96xbf16>
    %cst_25 = arith.constant dense<0.000000e+00> : vector<16x96xf32>
    %54 = tpu.matmul %51, %53, %cst_25 {dimension_numbers = #tpu.dot_dimension_numbers<[1], [0], [0], [1], [0, 0, 1, 1], [], []>} : vector<16x32xbf16>, vector<32x96xbf16>, vector<16x96xf32> -> vector<16x96xf32>
    %55 = vector.broadcast %43 : vector<1x96xf32> to vector<16x96xf32>
    %56 = arith.addf %54, %55 : vector<16x96xf32>
    %57 = vector.extract_strided_slice %56 {offsets = [0, 0], sizes = [16, 16], strides = [1, 1]} : vector<16x96xf32> to vector<16x16xf32>
    %58 = vector.shape_cast %57 : vector<16x16xf32> to vector<2x8x16xf32>
    %59 = vector.extract_strided_slice %56 {offsets = [0, 16], sizes = [16, 16], strides = [1, 1]} : vector<16x96xf32> to vector<16x16xf32>
    %60 = vector.shape_cast %59 : vector<16x16xf32> to vector<2x8x16xf32>
    %61 = tpu.concatenate %58, %60 in 0 : vector<2x8x16xf32>, vector<2x8x16xf32> -> vector<4x8x16xf32>
    %62 = vector.extract_strided_slice %56 {offsets = [0, 32], sizes = [16, 16], strides = [1, 1]} : vector<16x96xf32> to vector<16x16xf32>
    %63 = vector.shape_cast %62 : vector<16x16xf32> to vector<2x8x16xf32>
    %64 = vector.extract_strided_slice %56 {offsets = [0, 48], sizes = [16, 16], strides = [1, 1]} : vector<16x96xf32> to vector<16x16xf32>
    %65 = vector.shape_cast %64 : vector<16x16xf32> to vector<2x8x16xf32>
    %66 = tpu.concatenate %63, %65 in 0 : vector<2x8x16xf32>, vector<2x8x16xf32> -> vector<4x8x16xf32>
    %67 = vector.extract_strided_slice %56 {offsets = [0, 64], sizes = [16, 16], strides = [1, 1]} : vector<16x96xf32> to vector<16x16xf32>
    %68 = vector.shape_cast %67 : vector<16x16xf32> to vector<2x8x16xf32>
    %69 = vector.extract_strided_slice %56 {offsets = [0, 80], sizes = [16, 16], strides = [1, 1]} : vector<16x96xf32> to vector<16x16xf32>
    %70 = vector.shape_cast %69 : vector<16x16xf32> to vector<2x8x16xf32>
    %71 = tpu.concatenate %68, %70 in 0 : vector<2x8x16xf32>, vector<2x8x16xf32> -> vector<4x8x16xf32>
    %72 = arith.truncf %61 : vector<4x8x16xf32> to vector<4x8x16xbf16>
    %73 = arith.truncf %66 : vector<4x8x16xf32> to vector<4x8x16xbf16>
    %74 = arith.truncf %71 : vector<4x8x16xf32> to vector<4x8x16xbf16>
    "tpu.trace_start"() <{level = 10 : i32, message = "bqd,bkd->bqk"}> : () -> ()
    %cst_26 = arith.constant dense<0.000000e+00> : vector<4x8x8xf32>
    %75 = tpu.matmul %72, %73, %cst_26 {dimension_numbers = #tpu.dot_dimension_numbers<[2], [2], [1], [1], [0, 0, 0, 1, 1, 1], [0], [0]>} : vector<4x8x16xbf16>, vector<4x8x16xbf16>, vector<4x8x8xf32> -> vector<4x8x8xf32>
    "tpu.trace_stop"() : () -> ()
    %cst_27 = arith.constant 2.500000e-01 : f32
    %76 = vector.broadcast %cst_27 : f32 to vector<4x8x8xf32>
    %77 = arith.mulf %75, %76 : vector<4x8x8xf32>
    %78 = vector.shape_cast %77 : vector<4x8x8xf32> to vector<2x2x8x8xf32>
    %79 = vector.shape_cast %40 : vector<2x8xf32> to vector<1x2x1x8xf32>
    %80 = vector.broadcast %79 : vector<1x2x1x8xf32> to vector<2x2x8x8xf32>
    %81 = arith.addf %78, %80 : vector<2x2x8x8xf32>
    %cst_28 = arith.constant dense<0xFF800000> : vector<2x2x8xf32>
    %82 = vector.multi_reduction <maximumf>, %81, %cst_28 [3] : vector<2x2x8x8xf32> to vector<2x2x8xf32>
    %83 = vector.shape_cast %82 : vector<2x2x8xf32> to vector<2x2x8x1xf32>
    %84 = vector.broadcast %83 : vector<2x2x8x1xf32> to vector<2x2x8x8xf32>
    %85 = arith.subf %81, %84 : vector<2x2x8x8xf32>
    %86 = math.exp %85 : vector<2x2x8x8xf32>
    %cst_29 = arith.constant dense<0.000000e+00> : vector<2x2x8xf32>
    %87 = vector.multi_reduction <add>, %86, %cst_29 [3] : vector<2x2x8x8xf32> to vector<2x2x8xf32>
    %88 = vector.shape_cast %87 : vector<2x2x8xf32> to vector<2x2x8x1xf32>
    %89 = tpu.reciprocal %88 {approx = true} : vector<2x2x8x1xf32> -> vector<2x2x8x1xf32>
    %90 = vector.broadcast %89 : vector<2x2x8x1xf32> to vector<2x2x8x8xf32>
    %91 = arith.mulf %86, %90 : vector<2x2x8x8xf32>
    %92 = vector.shape_cast %91 : vector<2x2x8x8xf32> to vector<4x8x8xf32>
    %93 = arith.truncf %92 : vector<4x8x8xf32> to vector<4x8x8xbf16>
    "tpu.trace_start"() <{level = 10 : i32, message = "bqk,bkd->bqd"}> : () -> ()
    %cst_30 = arith.constant dense<0.000000e+00> : vector<4x8x16xf32>
    %94 = tpu.matmul %93, %74, %cst_30 {dimension_numbers = #tpu.dot_dimension_numbers<[2], [1], [1], [2], [0, 0, 0, 1, 1, 2], [0], [0]>} : vector<4x8x8xbf16>, vector<4x8x16xbf16>, vector<4x8x16xf32> -> vector<4x8x16xf32>
    "tpu.trace_stop"() : () -> ()
    %c0_31 = arith.constant 0 : index
    %c0_32 = arith.constant 0 : index
    %c0_33 = arith.constant 0 : index
    %c0_34 = arith.constant 0 : index
    %95 = vector.load %arg7[%c0_31, %c0_32, %c0_33, %c0_34] : memref<2x2x16x32xbf16, #tpu.memory_space<vmem>>, vector<1x2x16x32xbf16>
    %96 = vector.shape_cast %95 : vector<1x2x16x32xbf16> to vector<2x16x32xbf16>
    %97 = vector.extract_strided_slice %94 {offsets = [0, 0, 0], sizes = [2, 8, 16], strides = [1, 1, 1]} : vector<4x8x16xf32> to vector<2x8x16xf32>
    %98 = vector.shape_cast %97 : vector<2x8x16xf32> to vector<16x16xf32>
    %99 = arith.truncf %98 : vector<16x16xf32> to vector<16x16xbf16>
    %100 = vector.extract_strided_slice %96 {offsets = [0, 0, 0], sizes = [1, 16, 32], strides = [1, 1, 1]} : vector<2x16x32xbf16> to vector<1x16x32xbf16>
    %101 = vector.shape_cast %100 : vector<1x16x32xbf16> to vector<16x32xbf16>
    %cst_35 = arith.constant dense<0.000000e+00> : vector<16x32xf32>
    %102 = tpu.matmul %99, %101, %cst_35 {dimension_numbers = #tpu.dot_dimension_numbers<[1], [0], [0], [1], [0, 0, 1, 1], [], []>} : vector<16x16xbf16>, vector<16x32xbf16>, vector<16x32xf32> -> vector<16x32xf32>
    %103 = vector.broadcast %44 : vector<1x32xf32> to vector<16x32xf32>
    %104 = arith.addf %103, %102 : vector<16x32xf32>
    %105 = vector.extract_strided_slice %94 {offsets = [2, 0, 0], sizes = [2, 8, 16], strides = [1, 1, 1]} : vector<4x8x16xf32> to vector<2x8x16xf32>
    %106 = vector.shape_cast %105 : vector<2x8x16xf32> to vector<16x16xf32>
    %107 = arith.truncf %106 : vector<16x16xf32> to vector<16x16xbf16>
    %108 = vector.extract_strided_slice %96 {offsets = [1, 0, 0], sizes = [1, 16, 32], strides = [1, 1, 1]} : vector<2x16x32xbf16> to vector<1x16x32xbf16>
    %109 = vector.shape_cast %108 : vector<1x16x32xbf16> to vector<16x32xbf16>
    %cst_36 = arith.constant dense<0.000000e+00> : vector<16x32xf32>
    %110 = tpu.matmul %107, %109, %cst_36 {dimension_numbers = #tpu.dot_dimension_numbers<[1], [0], [0], [1], [0, 0, 1, 1], [], []>} : vector<16x16xbf16>, vector<16x32xbf16>, vector<16x32xf32> -> vector<16x32xf32>
    %111 = arith.addf %104, %110 : vector<16x32xf32>
    %112 = arith.addf %35, %111 : vector<16x32xf32>
    %cst_37 = arith.constant dense<0.000000e+00> : vector<16xf32>
    %113 = vector.multi_reduction <add>, %112, %cst_37 [1] : vector<16x32xf32> to vector<16xf32>
    %114 = vector.shape_cast %113 : vector<16xf32> to vector<16x1xf32>
    %cst_38 = arith.constant 3.200000e+01 : f32
    %115 = vector.broadcast %cst_38 : f32 to vector<16x1xf32>
    %116 = arith.divf %114, %115 : vector<16x1xf32>
    %117 = vector.broadcast %116 : vector<16x1xf32> to vector<16x32xf32>
    %118 = arith.subf %112, %117 : vector<16x32xf32>
    %119 = arith.mulf %118, %118 : vector<16x32xf32>
    %cst_39 = arith.constant dense<0.000000e+00> : vector<16xf32>
    %120 = vector.multi_reduction <add>, %119, %cst_39 [1] : vector<16x32xf32> to vector<16xf32>
    %121 = vector.shape_cast %120 : vector<16xf32> to vector<16x1xf32>
    %cst_40 = arith.constant 3.200000e+01 : f32
    %122 = vector.broadcast %cst_40 : f32 to vector<16x1xf32>
    %123 = arith.divf %121, %122 : vector<16x1xf32>
    %124 = vector.broadcast %116 : vector<16x1xf32> to vector<16x32xf32>
    %125 = arith.subf %112, %124 : vector<16x32xf32>
    %cst_41 = arith.constant 9.99999996E-13 : f32
    %126 = vector.broadcast %cst_41 : f32 to vector<16x1xf32>
    %127 = arith.addf %123, %126 : vector<16x1xf32>
    %128 = math.rsqrt %127 : vector<16x1xf32>
    %129 = vector.broadcast %128 : vector<16x1xf32> to vector<16x32xf32>
    %130 = arith.mulf %125, %129 : vector<16x32xf32>
    %131 = vector.broadcast %47 : vector<1x32xf32> to vector<16x32xf32>
    %132 = arith.mulf %130, %131 : vector<16x32xf32>
    %133 = vector.broadcast %48 : vector<1x32xf32> to vector<16x32xf32>
    %134 = arith.addf %132, %133 : vector<16x32xf32>
    %135 = arith.truncf %134 : vector<16x32xf32> to vector<16x32xbf16>
    %c0_42 = arith.constant 0 : index
    %c0_43 = arith.constant 0 : index
    %c0_44 = arith.constant 0 : index
    %136 = vector.load %arg8[%c0_42, %c0_43, %c0_44] : memref<2x32x64xbf16, #tpu.memory_space<vmem>>, vector<1x32x64xbf16>
    %137 = vector.shape_cast %136 : vector<1x32x64xbf16> to vector<32x64xbf16>
    %cst_45 = arith.constant dense<0.000000e+00> : vector<16x64xf32>
    %138 = tpu.matmul %135, %137, %cst_45 {dimension_numbers = #tpu.dot_dimension_numbers<[1], [0], [0], [1], [0, 0, 1, 1], [], []>} : vector<16x32xbf16>, vector<32x64xbf16>, vector<16x64xf32> -> vector<16x64xf32>
    %139 = vector.broadcast %45 : vector<1x64xf32> to vector<16x64xf32>
    %140 = arith.addf %138, %139 : vector<16x64xf32>
    %141 = arith.mulf %140, %140 : vector<16x64xf32>
    %142 = arith.mulf %140, %141 : vector<16x64xf32>
    %cst_46 = arith.constant 4.471500e-02 : f32
    %143 = vector.broadcast %cst_46 : f32 to vector<16x64xf32>
    %144 = arith.mulf %143, %142 : vector<16x64xf32>
    %145 = arith.addf %140, %144 : vector<16x64xf32>
    %cst_47 = arith.constant 0.797884583 : f32
    %146 = vector.broadcast %cst_47 : f32 to vector<16x64xf32>
    %147 = arith.mulf %146, %145 : vector<16x64xf32>
    %148 = math.tanh %147 : vector<16x64xf32>
    %cst_48 = arith.constant 1.000000e+00 : f32
    %149 = vector.broadcast %cst_48 : f32 to vector<16x64xf32>
    %150 = arith.addf %149, %148 : vector<16x64xf32>
    %cst_49 = arith.constant 5.000000e-01 : f32
    %151 = vector.broadcast %cst_49 : f32 to vector<16x64xf32>
    %152 = arith.mulf %151, %150 : vector<16x64xf32>
    %153 = arith.mulf %140, %152 : vector<16x64xf32>
    %154 = arith.truncf %153 : vector<16x64xf32> to vector<16x64xbf16>
    %c0_50 = arith.constant 0 : index
    %c0_51 = arith.constant 0 : index
    %c0_52 = arith.constant 0 : index
    %155 = vector.load %arg9[%c0_50, %c0_51, %c0_52] : memref<2x64x32xbf16, #tpu.memory_space<vmem>>, vector<1x64x32xbf16>
    %156 = vector.shape_cast %155 : vector<1x64x32xbf16> to vector<64x32xbf16>
    %cst_53 = arith.constant dense<0.000000e+00> : vector<16x32xf32>
    %157 = tpu.matmul %154, %156, %cst_53 {dimension_numbers = #tpu.dot_dimension_numbers<[1], [0], [0], [1], [0, 0, 1, 1], [], []>} : vector<16x64xbf16>, vector<64x32xbf16>, vector<16x32xf32> -> vector<16x32xf32>
    %158 = vector.broadcast %46 : vector<1x32xf32> to vector<16x32xf32>
    %159 = arith.addf %157, %158 : vector<16x32xf32>
    %160 = arith.addf %134, %159 : vector<16x32xf32>
    %cst_54 = arith.constant dense<0.000000e+00> : vector<16xf32>
    %161 = vector.multi_reduction <add>, %160, %cst_54 [1] : vector<16x32xf32> to vector<16xf32>
    %162 = vector.shape_cast %161 : vector<16xf32> to vector<16x1xf32>
    %cst_55 = arith.constant 3.200000e+01 : f32
    %163 = vector.broadcast %cst_55 : f32 to vector<16x1xf32>
    %164 = arith.divf %162, %163 : vector<16x1xf32>
    %165 = vector.broadcast %164 : vector<16x1xf32> to vector<16x32xf32>
    %166 = arith.subf %160, %165 : vector<16x32xf32>
    %167 = arith.mulf %166, %166 : vector<16x32xf32>
    %cst_56 = arith.constant dense<0.000000e+00> : vector<16xf32>
    %168 = vector.multi_reduction <add>, %167, %cst_56 [1] : vector<16x32xf32> to vector<16xf32>
    %169 = vector.shape_cast %168 : vector<16xf32> to vector<16x1xf32>
    %cst_57 = arith.constant 3.200000e+01 : f32
    %170 = vector.broadcast %cst_57 : f32 to vector<16x1xf32>
    %171 = arith.divf %169, %170 : vector<16x1xf32>
    %172 = vector.broadcast %164 : vector<16x1xf32> to vector<16x32xf32>
    %173 = arith.subf %160, %172 : vector<16x32xf32>
    %cst_58 = arith.constant 9.99999996E-13 : f32
    %174 = vector.broadcast %cst_58 : f32 to vector<16x1xf32>
    %175 = arith.addf %171, %174 : vector<16x1xf32>
    %176 = math.rsqrt %175 : vector<16x1xf32>
    %177 = vector.broadcast %176 : vector<16x1xf32> to vector<16x32xf32>
    %178 = arith.mulf %173, %177 : vector<16x32xf32>
    %179 = vector.broadcast %49 : vector<1x32xf32> to vector<16x32xf32>
    %180 = arith.mulf %178, %179 : vector<16x32xf32>
    %181 = vector.broadcast %50 : vector<1x32xf32> to vector<16x32xf32>
    %182 = arith.addf %180, %181 : vector<16x32xf32>
    %c1_59 = arith.constant 1 : index
    %c0_60 = arith.constant 0 : index
    %c0_61 = arith.constant 0 : index
    %183 = vector.load %arg10[%c1_59, %c0_60, %c0_61] : memref<2x8x128xf32, #tpu.memory_space<vmem>>, vector<1x8x128xf32>
    %184 = vector.shape_cast %183 : vector<1x8x128xf32> to vector<8x128xf32>
    %185 = vector.extract_strided_slice %184 {offsets = [0, 0], sizes = [1, 96], strides = [1, 1]} : vector<8x128xf32> to vector<1x96xf32>
    %186 = vector.extract_strided_slice %184 {offsets = [1, 0], sizes = [1, 32], strides = [1, 1]} : vector<8x128xf32> to vector<1x32xf32>
    %187 = vector.extract_strided_slice %184 {offsets = [2, 0], sizes = [1, 64], strides = [1, 1]} : vector<8x128xf32> to vector<1x64xf32>
    %188 = vector.extract_strided_slice %184 {offsets = [3, 0], sizes = [1, 32], strides = [1, 1]} : vector<8x128xf32> to vector<1x32xf32>
    %189 = vector.extract_strided_slice %184 {offsets = [4, 0], sizes = [1, 32], strides = [1, 1]} : vector<8x128xf32> to vector<1x32xf32>
    %190 = vector.extract_strided_slice %184 {offsets = [5, 0], sizes = [1, 32], strides = [1, 1]} : vector<8x128xf32> to vector<1x32xf32>
    %191 = vector.extract_strided_slice %184 {offsets = [6, 0], sizes = [1, 32], strides = [1, 1]} : vector<8x128xf32> to vector<1x32xf32>
    %192 = vector.extract_strided_slice %184 {offsets = [7, 0], sizes = [1, 32], strides = [1, 1]} : vector<8x128xf32> to vector<1x32xf32>
    %193 = arith.truncf %182 : vector<16x32xf32> to vector<16x32xbf16>
    %c1_62 = arith.constant 1 : index
    %c0_63 = arith.constant 0 : index
    %c0_64 = arith.constant 0 : index
    %194 = vector.load %arg6[%c1_62, %c0_63, %c0_64] : memref<2x32x96xbf16, #tpu.memory_space<vmem>>, vector<1x32x96xbf16>
    %195 = vector.shape_cast %194 : vector<1x32x96xbf16> to vector<32x96xbf16>
    %cst_65 = arith.constant dense<0.000000e+00> : vector<16x96xf32>
    %196 = tpu.matmul %193, %195, %cst_65 {dimension_numbers = #tpu.dot_dimension_numbers<[1], [0], [0], [1], [0, 0, 1, 1], [], []>} : vector<16x32xbf16>, vector<32x96xbf16>, vector<16x96xf32> -> vector<16x96xf32>
    %197 = vector.broadcast %185 : vector<1x96xf32> to vector<16x96xf32>
    %198 = arith.addf %196, %197 : vector<16x96xf32>
    %199 = vector.extract_strided_slice %198 {offsets = [0, 0], sizes = [16, 16], strides = [1, 1]} : vector<16x96xf32> to vector<16x16xf32>
    %200 = vector.shape_cast %199 : vector<16x16xf32> to vector<2x8x16xf32>
    %201 = vector.extract_strided_slice %198 {offsets = [0, 16], sizes = [16, 16], strides = [1, 1]} : vector<16x96xf32> to vector<16x16xf32>
    %202 = vector.shape_cast %201 : vector<16x16xf32> to vector<2x8x16xf32>
    %203 = tpu.concatenate %200, %202 in 0 : vector<2x8x16xf32>, vector<2x8x16xf32> -> vector<4x8x16xf32>
    %204 = vector.extract_strided_slice %198 {offsets = [0, 32], sizes = [16, 16], strides = [1, 1]} : vector<16x96xf32> to vector<16x16xf32>
    %205 = vector.shape_cast %204 : vector<16x16xf32> to vector<2x8x16xf32>
    %206 = vector.extract_strided_slice %198 {offsets = [0, 48], sizes = [16, 16], strides = [1, 1]} : vector<16x96xf32> to vector<16x16xf32>
    %207 = vector.shape_cast %206 : vector<16x16xf32> to vector<2x8x16xf32>
    %208 = tpu.concatenate %205, %207 in 0 : vector<2x8x16xf32>, vector<2x8x16xf32> -> vector<4x8x16xf32>
    %209 = vector.extract_strided_slice %198 {offsets = [0, 64], sizes = [16, 16], strides = [1, 1]} : vector<16x96xf32> to vector<16x16xf32>
    %210 = vector.shape_cast %209 : vector<16x16xf32> to vector<2x8x16xf32>
    %211 = vector.extract_strided_slice %198 {offsets = [0, 80], sizes = [16, 16], strides = [1, 1]} : vector<16x96xf32> to vector<16x16xf32>
    %212 = vector.shape_cast %211 : vector<16x16xf32> to vector<2x8x16xf32>
    %213 = tpu.concatenate %210, %212 in 0 : vector<2x8x16xf32>, vector<2x8x16xf32> -> vector<4x8x16xf32>
    %214 = arith.truncf %203 : vector<4x8x16xf32> to vector<4x8x16xbf16>
    %215 = arith.truncf %208 : vector<4x8x16xf32> to vector<4x8x16xbf16>
    %216 = arith.truncf %213 : vector<4x8x16xf32> to vector<4x8x16xbf16>
    "tpu.trace_start"() <{level = 10 : i32, message = "bqd,bkd->bqk"}> : () -> ()
    %cst_66 = arith.constant dense<0.000000e+00> : vector<4x8x8xf32>
    %217 = tpu.matmul %214, %215, %cst_66 {dimension_numbers = #tpu.dot_dimension_numbers<[2], [2], [1], [1], [0, 0, 0, 1, 1, 1], [0], [0]>} : vector<4x8x16xbf16>, vector<4x8x16xbf16>, vector<4x8x8xf32> -> vector<4x8x8xf32>
    "tpu.trace_stop"() : () -> ()
    %cst_67 = arith.constant 2.500000e-01 : f32
    %218 = vector.broadcast %cst_67 : f32 to vector<4x8x8xf32>
    %219 = arith.mulf %217, %218 : vector<4x8x8xf32>
    %220 = vector.shape_cast %219 : vector<4x8x8xf32> to vector<2x2x8x8xf32>
    %221 = vector.shape_cast %40 : vector<2x8xf32> to vector<1x2x1x8xf32>
    %222 = vector.broadcast %221 : vector<1x2x1x8xf32> to vector<2x2x8x8xf32>
    %223 = arith.addf %220, %222 : vector<2x2x8x8xf32>
    %cst_68 = arith.constant dense<0xFF800000> : vector<2x2x8xf32>
    %224 = vector.multi_reduction <maximumf>, %223, %cst_68 [3] : vector<2x2x8x8xf32> to vector<2x2x8xf32>
    %225 = vector.shape_cast %224 : vector<2x2x8xf32> to vector<2x2x8x1xf32>
    %226 = vector.broadcast %225 : vector<2x2x8x1xf32> to vector<2x2x8x8xf32>
    %227 = arith.subf %223, %226 : vector<2x2x8x8xf32>
    %228 = math.exp %227 : vector<2x2x8x8xf32>
    %cst_69 = arith.constant dense<0.000000e+00> : vector<2x2x8xf32>
    %229 = vector.multi_reduction <add>, %228, %cst_69 [3] : vector<2x2x8x8xf32> to vector<2x2x8xf32>
    %230 = vector.shape_cast %229 : vector<2x2x8xf32> to vector<2x2x8x1xf32>
    %231 = tpu.reciprocal %230 {approx = true} : vector<2x2x8x1xf32> -> vector<2x2x8x1xf32>
    %232 = vector.broadcast %231 : vector<2x2x8x1xf32> to vector<2x2x8x8xf32>
    %233 = arith.mulf %228, %232 : vector<2x2x8x8xf32>
    %234 = vector.shape_cast %233 : vector<2x2x8x8xf32> to vector<4x8x8xf32>
    %235 = arith.truncf %234 : vector<4x8x8xf32> to vector<4x8x8xbf16>
    "tpu.trace_start"() <{level = 10 : i32, message = "bqk,bkd->bqd"}> : () -> ()
    %cst_70 = arith.constant dense<0.000000e+00> : vector<4x8x16xf32>
    %236 = tpu.matmul %235, %216, %cst_70 {dimension_numbers = #tpu.dot_dimension_numbers<[2], [1], [1], [2], [0, 0, 0, 1, 1, 2], [0], [0]>} : vector<4x8x8xbf16>, vector<4x8x16xbf16>, vector<4x8x16xf32> -> vector<4x8x16xf32>
    "tpu.trace_stop"() : () -> ()
    %c1_71 = arith.constant 1 : index
    %c0_72 = arith.constant 0 : index
    %c0_73 = arith.constant 0 : index
    %c0_74 = arith.constant 0 : index
    %237 = vector.load %arg7[%c1_71, %c0_72, %c0_73, %c0_74] : memref<2x2x16x32xbf16, #tpu.memory_space<vmem>>, vector<1x2x16x32xbf16>
    %238 = vector.shape_cast %237 : vector<1x2x16x32xbf16> to vector<2x16x32xbf16>
    %239 = vector.extract_strided_slice %236 {offsets = [0, 0, 0], sizes = [2, 8, 16], strides = [1, 1, 1]} : vector<4x8x16xf32> to vector<2x8x16xf32>
    %240 = vector.shape_cast %239 : vector<2x8x16xf32> to vector<16x16xf32>
    %241 = arith.truncf %240 : vector<16x16xf32> to vector<16x16xbf16>
    %242 = vector.extract_strided_slice %238 {offsets = [0, 0, 0], sizes = [1, 16, 32], strides = [1, 1, 1]} : vector<2x16x32xbf16> to vector<1x16x32xbf16>
    %243 = vector.shape_cast %242 : vector<1x16x32xbf16> to vector<16x32xbf16>
    %cst_75 = arith.constant dense<0.000000e+00> : vector<16x32xf32>
    %244 = tpu.matmul %241, %243, %cst_75 {dimension_numbers = #tpu.dot_dimension_numbers<[1], [0], [0], [1], [0, 0, 1, 1], [], []>} : vector<16x16xbf16>, vector<16x32xbf16>, vector<16x32xf32> -> vector<16x32xf32>
    %245 = vector.broadcast %186 : vector<1x32xf32> to vector<16x32xf32>
    %246 = arith.addf %245, %244 : vector<16x32xf32>
    %247 = vector.extract_strided_slice %236 {offsets = [2, 0, 0], sizes = [2, 8, 16], strides = [1, 1, 1]} : vector<4x8x16xf32> to vector<2x8x16xf32>
    %248 = vector.shape_cast %247 : vector<2x8x16xf32> to vector<16x16xf32>
    %249 = arith.truncf %248 : vector<16x16xf32> to vector<16x16xbf16>
    %250 = vector.extract_strided_slice %238 {offsets = [1, 0, 0], sizes = [1, 16, 32], strides = [1, 1, 1]} : vector<2x16x32xbf16> to vector<1x16x32xbf16>
    %251 = vector.shape_cast %250 : vector<1x16x32xbf16> to vector<16x32xbf16>
    %cst_76 = arith.constant dense<0.000000e+00> : vector<16x32xf32>
    %252 = tpu.matmul %249, %251, %cst_76 {dimension_numbers = #tpu.dot_dimension_numbers<[1], [0], [0], [1], [0, 0, 1, 1], [], []>} : vector<16x16xbf16>, vector<16x32xbf16>, vector<16x32xf32> -> vector<16x32xf32>
    %253 = arith.addf %246, %252 : vector<16x32xf32>
    %254 = arith.addf %182, %253 : vector<16x32xf32>
    %cst_77 = arith.constant dense<0.000000e+00> : vector<16xf32>
    %255 = vector.multi_reduction <add>, %254, %cst_77 [1] : vector<16x32xf32> to vector<16xf32>
    %256 = vector.shape_cast %255 : vector<16xf32> to vector<16x1xf32>
    %cst_78 = arith.constant 3.200000e+01 : f32
    %257 = vector.broadcast %cst_78 : f32 to vector<16x1xf32>
    %258 = arith.divf %256, %257 : vector<16x1xf32>
    %259 = vector.broadcast %258 : vector<16x1xf32> to vector<16x32xf32>
    %260 = arith.subf %254, %259 : vector<16x32xf32>
    %261 = arith.mulf %260, %260 : vector<16x32xf32>
    %cst_79 = arith.constant dense<0.000000e+00> : vector<16xf32>
    %262 = vector.multi_reduction <add>, %261, %cst_79 [1] : vector<16x32xf32> to vector<16xf32>
    %263 = vector.shape_cast %262 : vector<16xf32> to vector<16x1xf32>
    %cst_80 = arith.constant 3.200000e+01 : f32
    %264 = vector.broadcast %cst_80 : f32 to vector<16x1xf32>
    %265 = arith.divf %263, %264 : vector<16x1xf32>
    %266 = vector.broadcast %258 : vector<16x1xf32> to vector<16x32xf32>
    %267 = arith.subf %254, %266 : vector<16x32xf32>
    %cst_81 = arith.constant 9.99999996E-13 : f32
    %268 = vector.broadcast %cst_81 : f32 to vector<16x1xf32>
    %269 = arith.addf %265, %268 : vector<16x1xf32>
    %270 = math.rsqrt %269 : vector<16x1xf32>
    %271 = vector.broadcast %270 : vector<16x1xf32> to vector<16x32xf32>
    %272 = arith.mulf %267, %271 : vector<16x32xf32>
    %273 = vector.broadcast %189 : vector<1x32xf32> to vector<16x32xf32>
    %274 = arith.mulf %272, %273 : vector<16x32xf32>
    %275 = vector.broadcast %190 : vector<1x32xf32> to vector<16x32xf32>
    %276 = arith.addf %274, %275 : vector<16x32xf32>
    %277 = arith.truncf %276 : vector<16x32xf32> to vector<16x32xbf16>
    %c1_82 = arith.constant 1 : index
    %c0_83 = arith.constant 0 : index
    %c0_84 = arith.constant 0 : index
    %278 = vector.load %arg8[%c1_82, %c0_83, %c0_84] : memref<2x32x64xbf16, #tpu.memory_space<vmem>>, vector<1x32x64xbf16>
    %279 = vector.shape_cast %278 : vector<1x32x64xbf16> to vector<32x64xbf16>
    %cst_85 = arith.constant dense<0.000000e+00> : vector<16x64xf32>
    %280 = tpu.matmul %277, %279, %cst_85 {dimension_numbers = #tpu.dot_dimension_numbers<[1], [0], [0], [1], [0, 0, 1, 1], [], []>} : vector<16x32xbf16>, vector<32x64xbf16>, vector<16x64xf32> -> vector<16x64xf32>
    %281 = vector.broadcast %187 : vector<1x64xf32> to vector<16x64xf32>
    %282 = arith.addf %280, %281 : vector<16x64xf32>
    %283 = arith.mulf %282, %282 : vector<16x64xf32>
    %284 = arith.mulf %282, %283 : vector<16x64xf32>
    %cst_86 = arith.constant 4.471500e-02 : f32
    %285 = vector.broadcast %cst_86 : f32 to vector<16x64xf32>
    %286 = arith.mulf %285, %284 : vector<16x64xf32>
    %287 = arith.addf %282, %286 : vector<16x64xf32>
    %cst_87 = arith.constant 0.797884583 : f32
    %288 = vector.broadcast %cst_87 : f32 to vector<16x64xf32>
    %289 = arith.mulf %288, %287 : vector<16x64xf32>
    %290 = math.tanh %289 : vector<16x64xf32>
    %cst_88 = arith.constant 1.000000e+00 : f32
    %291 = vector.broadcast %cst_88 : f32 to vector<16x64xf32>
    %292 = arith.addf %291, %290 : vector<16x64xf32>
    %cst_89 = arith.constant 5.000000e-01 : f32
    %293 = vector.broadcast %cst_89 : f32 to vector<16x64xf32>
    %294 = arith.mulf %293, %292 : vector<16x64xf32>
    %295 = arith.mulf %282, %294 : vector<16x64xf32>
    %296 = arith.truncf %295 : vector<16x64xf32> to vector<16x64xbf16>
    %c1_90 = arith.constant 1 : index
    %c0_91 = arith.constant 0 : index
    %c0_92 = arith.constant 0 : index
    %297 = vector.load %arg9[%c1_90, %c0_91, %c0_92] : memref<2x64x32xbf16, #tpu.memory_space<vmem>>, vector<1x64x32xbf16>
    %298 = vector.shape_cast %297 : vector<1x64x32xbf16> to vector<64x32xbf16>
    %cst_93 = arith.constant dense<0.000000e+00> : vector<16x32xf32>
    %299 = tpu.matmul %296, %298, %cst_93 {dimension_numbers = #tpu.dot_dimension_numbers<[1], [0], [0], [1], [0, 0, 1, 1], [], []>} : vector<16x64xbf16>, vector<64x32xbf16>, vector<16x32xf32> -> vector<16x32xf32>
    %300 = vector.broadcast %188 : vector<1x32xf32> to vector<16x32xf32>
    %301 = arith.addf %299, %300 : vector<16x32xf32>
    %302 = arith.addf %276, %301 : vector<16x32xf32>
    %cst_94 = arith.constant dense<0.000000e+00> : vector<16xf32>
    %303 = vector.multi_reduction <add>, %302, %cst_94 [1] : vector<16x32xf32> to vector<16xf32>
    %304 = vector.shape_cast %303 : vector<16xf32> to vector<16x1xf32>
    %cst_95 = arith.constant 3.200000e+01 : f32
    %305 = vector.broadcast %cst_95 : f32 to vector<16x1xf32>
    %306 = arith.divf %304, %305 : vector<16x1xf32>
    %307 = vector.broadcast %306 : vector<16x1xf32> to vector<16x32xf32>
    %308 = arith.subf %302, %307 : vector<16x32xf32>
    %309 = arith.mulf %308, %308 : vector<16x32xf32>
    %cst_96 = arith.constant dense<0.000000e+00> : vector<16xf32>
    %310 = vector.multi_reduction <add>, %309, %cst_96 [1] : vector<16x32xf32> to vector<16xf32>
    %311 = vector.shape_cast %310 : vector<16xf32> to vector<16x1xf32>
    %cst_97 = arith.constant 3.200000e+01 : f32
    %312 = vector.broadcast %cst_97 : f32 to vector<16x1xf32>
    %313 = arith.divf %311, %312 : vector<16x1xf32>
    %314 = vector.broadcast %306 : vector<16x1xf32> to vector<16x32xf32>
    %315 = arith.subf %302, %314 : vector<16x32xf32>
    %cst_98 = arith.constant 9.99999996E-13 : f32
    %316 = vector.broadcast %cst_98 : f32 to vector<16x1xf32>
    %317 = arith.addf %313, %316 : vector<16x1xf32>
    %318 = math.rsqrt %317 : vector<16x1xf32>
    %319 = vector.broadcast %318 : vector<16x1xf32> to vector<16x32xf32>
    %320 = arith.mulf %315, %319 : vector<16x32xf32>
    %321 = vector.broadcast %191 : vector<1x32xf32> to vector<16x32xf32>
    %322 = arith.mulf %320, %321 : vector<16x32xf32>
    %323 = vector.broadcast %192 : vector<1x32xf32> to vector<16x32xf32>
    %324 = arith.addf %322, %323 : vector<16x32xf32>
    %c0_99 = arith.constant 0 : index
    %c0_100 = arith.constant 0 : index
    %325 = vector.load %arg14[%c0_99, %c0_100] : memref<8x128xf32, #tpu.memory_space<vmem>>, vector<8x128xf32>
    %326 = vector.shape_cast %324 : vector<16x32xf32> to vector<2x8x32xf32>
    %327 = vector.extract_strided_slice %326 {offsets = [0, 0, 0], sizes = [2, 1, 32], strides = [1, 1, 1]} : vector<2x8x32xf32> to vector<2x1x32xf32>
    %328 = vector.shape_cast %327 : vector<2x1x32xf32> to vector<2x32xf32>
    %329 = arith.truncf %328 : vector<2x32xf32> to vector<2x32xbf16>
    %c0_101 = arith.constant 0 : index
    %c0_102 = arith.constant 0 : index
    %330 = vector.load %arg11[%c0_101, %c0_102] : memref<32x32xbf16, #tpu.memory_space<vmem>>, vector<32x32xbf16>
    %cst_103 = arith.constant dense<0.000000e+00> : vector<2x32xf32>
    %331 = tpu.matmul %329, %330, %cst_103 {dimension_numbers = #tpu.dot_dimension_numbers<[1], [0], [0], [1], [0, 0, 1, 1], [], []>} : vector<2x32xbf16>, vector<32x32xbf16>, vector<2x32xf32> -> vector<2x32xf32>
    %332 = vector.extract_strided_slice %325 {offsets = [0, 0], sizes = [1, 32], strides = [1, 1]} : vector<8x128xf32> to vector<1x32xf32>
    %333 = vector.broadcast %332 : vector<1x32xf32> to vector<2x32xf32>
    %334 = arith.addf %331, %333 : vector<2x32xf32>
    %335 = math.tanh %334 : vector<2x32xf32>
    %336 = arith.truncf %335 : vector<2x32xf32> to vector<2x32xbf16>
    %c0_104 = arith.constant 0 : index
    %c0_105 = arith.constant 0 : index
    %337 = vector.load %arg12[%c0_104, %c0_105] : memref<32x2xbf16, #tpu.memory_space<vmem>>, vector<32x2xbf16>
    %cst_106 = arith.constant dense<0.000000e+00> : vector<2x2xf32>
    %338 = tpu.matmul %336, %337, %cst_106 {dimension_numbers = #tpu.dot_dimension_numbers<[1], [0], [0], [1], [0, 0, 1, 1], [], []>} : vector<2x32xbf16>, vector<32x2xbf16>, vector<2x2xf32> -> vector<2x2xf32>
    %339 = vector.extract_strided_slice %325 {offsets = [1, 0], sizes = [1, 2], strides = [1, 1]} : vector<8x128xf32> to vector<1x2xf32>
    %340 = vector.broadcast %339 : vector<1x2xf32> to vector<2x2xf32>
    %341 = arith.addf %338, %340 : vector<2x2xf32>
    %c0_107 = arith.constant 0 : index
    %c0_108 = arith.constant 0 : index
    %342 = vector.load %arg2[%c0_107, %c0_108] : memref<2x16xbf16, #tpu.memory_space<vmem>>, vector<2x16xbf16>
    %c0_109 = arith.constant 0 : index
    %c0_110 = arith.constant 0 : index
    %343 = vector.load %arg13[%c0_109, %c0_110] : memref<16x128xbf16, #tpu.memory_space<vmem>>, vector<16x128xbf16>
    %cst_111 = arith.constant dense<0.000000e+00> : vector<2x128xf32>
    %344 = tpu.matmul %342, %343, %cst_111 {dimension_numbers = #tpu.dot_dimension_numbers<[1], [0], [0], [1], [0, 0, 1, 1], [], []>} : vector<2x16xbf16>, vector<16x128xbf16>, vector<2x128xf32> -> vector<2x128xf32>
    %345 = vector.extract_strided_slice %325 {offsets = [2, 0], sizes = [1, 128], strides = [1, 1]} : vector<8x128xf32> to vector<1x128xf32>
    %346 = vector.broadcast %345 : vector<1x128xf32> to vector<2x128xf32>
    %347 = arith.addf %344, %346 : vector<2x128xf32>
    %348 = vector.extract_strided_slice %325 {offsets = [3, 0], sizes = [1, 2], strides = [1, 1]} : vector<8x128xf32> to vector<1x2xf32>
    %349 = vector.broadcast %348 : vector<1x2xf32> to vector<2x2xf32>
    %350 = arith.mulf %341, %349 : vector<2x2xf32>
    %cst_112 = arith.constant dense<0.000000e+00> : vector<2xf32>
    %351 = vector.multi_reduction <add>, %350, %cst_112 [1] : vector<2x2xf32> to vector<2xf32>
    %352 = vector.shape_cast %351 : vector<2xf32> to vector<2x1xf32>
    %353 = vector.extract_strided_slice %325 {offsets = [4, 0], sizes = [1, 128], strides = [1, 1]} : vector<8x128xf32> to vector<1x128xf32>
    %354 = vector.broadcast %353 : vector<1x128xf32> to vector<2x128xf32>
    %355 = arith.mulf %347, %354 : vector<2x128xf32>
    %cst_113 = arith.constant dense<0.000000e+00> : vector<2xf32>
    %356 = vector.multi_reduction <add>, %355, %cst_113 [1] : vector<2x128xf32> to vector<2xf32>
    %357 = vector.shape_cast %356 : vector<2xf32> to vector<2x1xf32>
    %358 = arith.addf %352, %357 : vector<2x1xf32>
    %359 = vector.extract_strided_slice %325 {offsets = [5, 0], sizes = [1, 1], strides = [1, 1]} : vector<8x128xf32> to vector<1x1xf32>
    %360 = vector.broadcast %359 : vector<1x1xf32> to vector<2x1xf32>
    %361 = arith.addf %358, %360 : vector<2x1xf32>
    %362 = vector.shape_cast %361 : vector<2x1xf32> to vector<2x1xf32>
    %363 = vector.broadcast %362 : vector<2x1xf32> to vector<2x128xf32>
    %c0_114 = arith.constant 0 : index
    %c0_115 = arith.constant 0 : index
    %364 = vector.load %arg15[%c0_114, %c0_115] : memref<2x128xf32, #tpu.memory_space<vmem>>, vector<2x128xf32>
    tpu.vector_store %arg15[%c0_114, %c0_115], %363 {strides = array<i32>} : memref<2x128xf32, #tpu.memory_space<vmem>>, vector<2x128xf32>,
    return
  }
}

</mosaic_0001>

<bundles_post_ra>
// kernel: tpu_custom_call.1
= control target key start
LH: loop header
LB: loop body
LE: loop exit
PB: predicated region body
PF: predicated region fallthrough
CT: control target
= control target key end

     0   :  { %20 = vsyncpa [#allocation3], 0  ;;  %s3396_s0 = inlined_call_operand.vmem [shape: s32[16,1], index: 0, kind: input, shape index: {}]   ;;  %s3397_s1 = inlined_call_operand.hbm [shape: f32[2,8], index: 1, kind: input, shape index: {}]   ;;  %s3398_s2 = inlined_call_operand.vmem [shape: bf16[2,16], index: 2, kind: input, shape index: {}]   ;;  %s3399_s3 = inlined_call_operand.vmem [shape: bf16[100,32], index: 3, kind: input, shape index: {}]   ;;  %s3400_s4 = inlined_call_operand.vmem [shape: f32[16,32], index: 4, kind: input, shape index: {}]   ;;  %s3401_s5 = inlined_call_operand.vmem [shape: f32[2,32], index: 5, kind: input, shape index: {}]   ;;  %s3402_s6 = inlined_call_operand.vmem [shape: bf16[2,32,96], index: 6, kind: input, shape index: {}]   ;;  %s3403_s7 = inlined_call_operand.vmem [shape: bf16[2,2,16,32], index: 7, kind: input, shape index: {}]   ;;  %s3404_s8 = inlined_call_operand.vmem [shape: bf16[2,32,64], index: 8, kind: input, shape index: {}]   ;;  %s3405_s9 = inlined_call_operand.vmem [shape: bf16[2,64,32], index: 9, kind: input, shape index: {}]   ;;  %s3406_s10 = inlined_call_operand.vmem [shape: f32[2,8,128], index: 10, kind: input, shape index: {}]   ;;  %s3407_s11 = inlined_call_operand.vmem [shape: bf16[32,32], index: 11, kind: input, shape index: {}]   ;;  %s3408_s12 = inlined_call_operand.vmem [shape: bf16[32,2], index: 12, kind: input, shape index: {}]   ;;  %s3409_s13 = inlined_call_operand.vmem [shape: bf16[16,128], index: 13, kind: input, shape index: {}]   ;;  %s3410_s14 = inlined_call_operand.vmem [shape: f32[8,128], index: 14, kind: input, shape index: {}]   ;;  %s3411_s15 = inlined_call_operand.hbm [shape: f32[2,128], index: 15, kind: output, shape index: {}]  }
   0x1   :  { %21 = vsyncpa [#allocation4], 0  ;;  %s2810_s18 = smov [#allocation2]   ;;  %s2762_s22 = scalar_lea.hbm %s3397_s1, 32 }
   0x2   :  { %s30_s19 = sshll.u32 %s2810_s18, 4  ;;  %p2763_p0 = scmp.ne.s32.totalorder %s3397_s1, %s2762_s22  ;;  %s31_s19 = int_to_ptr.vmem [resolvable:$true] %s30_s19 }
   0x3   :  { %p2766_p1 = scmp.lt.u32.totalorder %s2762_s22, %s3397_s1 }
   0x5   :  { %p2768_p2 = pnand %p2766_p1, %p2763_p0 }
   0x7   :  { %2771 = shalt.err (!%p2768_p2)
}
   0x8   :  { %s2772_s27 = scalar_lea.vmem %s31_s19, 32  ;;  %p2777_p4 = scmp.lt.s32.totalorder %s31_s19, %s31_s19 }
   0x9   :  { %p2773_p3 = scmp.ne.s32.totalorder %s31_s19, %s2772_s27  ;;  %p2778_p5 = scmp.lt.s32.totalorder %s2772_s27, %s2772_s27 }
   0xb   :  { %p2779_p6 = por %p2778_p5, %p2777_p4 }
   0xd   :  { %p2780_p7 = pnand %p2779_p6, %p2773_p3 }
   0xf   :  { %2783 = shalt.err (!%p2780_p7)
}
  0x10   :  { %33 = dma.hbm_to_vmem [thread:$0]  %s3397_s1, 32, %s31_s19, [#allocation3]  }
  0x11   :  { %2806 = dma.done.wait [#allocation3], 32  }
  0x12   :  { %2807 = vsyncadd [#allocation3], 4294967264  ;;  %v2811_v0 = vmov 0   ;;  %v2812_v1 = vmov 0.0   ;;  %v64_v2 = vld [vmem:[%s3396_s0] sm:$0xff]  ;;  %v65_v4 = vld [vmem:[%s3396_s0 + $0x8] sm:$0xff]  ;;  %v66_v12 = vlaneseq }
  0x13   :  { %2656 = vset.pattern.permute.xlu0 %v2811_v0  ;;  %2431 = vmatprep.subr.bf16.mxu0 %v2812_v1  ;;  %v2668_v3 = vld [vmem:[%s3399_s3] sm:$0xff]   ;;  %v2669_v5 = vld [vmem:[%s3399_s3 + $0x8] sm:$0xff]   ;;  %vm137_vm0 = vcmask 1041408   ;;  %v2670_v6 = vld [vmem:[%s3399_s3 + $0x10] sm:$0xff]   ;;  %vm2813_vm1 = vmmov 0   ;;  %vm133_vm4 = vcmask 818176  }
  0x14   :  { %2449 = vmatprep.subr.bf16.mxu1 %v2812_v1  ;;  %2667 = vset.pattern.permute.xlu1 %v2811_v0  ;;  %v2674_v7 = vld [vmem:[%s3399_s3 + $0x30] ss:$0 sps:$4 sm:$0x33]   ;;  %v2671_v8 = vld [vmem:[%s3399_s3 + $0x18] sm:$0xff]   ;;  %v2672_v10 = vld [vmem:[%s3399_s3 + $0x20] sm:$0xff]   ;;  %v67_v13 = vand.u32 127, %v66_v12 }
  0x15   :  { %69 = vperm.xlu0 %2656, %v64_v2   ;;  %2432 = vmatpush3.bf16.msra.mxu0 %v2668_v3  ;;  %v139_v9 = vsel %vm137_vm0, %v2674_v7, 0  ;;  %v2673_v11 = vld [vmem:[%s3399_s3 + $0x28] sm:$0xff]   ;;  %v92_v19 = vld [vmem:[%s3400_s4] sm:$0xff]  ;;  %vm184_vm5 = vcmask 261120   ;;  %v2991_v58 = vshrl.u32 %v66_v12, 7  ;;  %s2814_s0 = smov 112  }
  0x16   :  { %2433 = vmatprep.subr.bf16.mxu0 %v2812_v1  ;;  %2445 = vmatprep.mubr.msk.bf16.mxu0 %vm2813_vm1, %v2812_v1  ;;  %v93_v21 = vld [vmem:[%s3400_s4 + $0x8] sm:$0xff]  ;;  %v2675_v39 = vld [vmem:[%s3402_s6] sm:$0xff]   ;;  %s2815_s26 = smov 96   ;;  %vm308_vm6 = vcmask 130048   ;;  %vm543_vm7 = vcmask 64512   ;;  %s2817_s27 = smov 64  }
  0x17   :  { %2453 = vmatprep.mubr.msk.bf16.mxu1 %vm2813_vm1, %v2812_v1  ;;  %2450 = vmatpush3.bf16.msra.mxu1 %v2675_v39  ;;  %v2676_v40 = vld [vmem:[%s3402_s6 + $0x8] sm:$0xff]   ;;  %v2276_v49 = vld [vmem:[%s3401_s5] ss:$0 sm:$0xff]  ;;  %v2277_v53 = vld [vmem:[%s3401_s5 + $0x1] ss:$0 sm:$0xff]  ;;  %v2994_v59 = vsub.s32 0, %v2991_v58 }
  0x18   :  { %2451 = vmatprep.subr.bf16.mxu1 %v2812_v1  ;;  %v2999_v60 = vld [vmem:[%s3406_s10] sm:$0xff]  ;;  %vm597_vm8 = vcmask 1043456   ;;  %vm1059_vm9 = vcmask 523264   ;;  %vm2045_vm10 = vcmask 1041409   ;;  %vm2229_vm11 = vcmask 9216  }
  0x19   :  { %72 = vperm.xlu0 %2656, %v65_v4   ;;  %2434 = vmatpush3.bf16.msra.mxu0 %v2669_v5  ;;  %v236_v61 = vrot.slane %v2999_v60, %v2994_v59 }
  0x1a   :  { %2435 = vmatprep.subr.bf16.mxu0 %v2812_v1 }
  0x1b   :  { %2452 = vmatpush3.bf16.msra.mxu1 %v2676_v40 }
  0x1c   :  { %2457 = vmatprep.subr.bf16.mxu1 %v2812_v1 }
  0x1d   :  { %2436 = vmatpush3.bf16.msra.mxu0 %v2670_v6 }
  0x1e   :  { %2437 = vmatprep.subr.bf16.mxu0 %v2812_v1 }
  0x21   :  { %2438 = vmatpush3.bf16.msra.mxu0 %v2671_v8 }
  0x22   :  { %2439 = vmatprep.subr.bf16.mxu0 %v2812_v1 }
  0x25   :  { %2440 = vmatpush3.bf16.msra.mxu0 %v2672_v10 }
  0x26   :  { %2441 = vmatprep.subr.bf16.mxu0 %v2812_v1 }
  0x29   :  { %2442 = vmatpush3.bf16.msra.mxu0 %v2673_v11 }
  0x2a   :  { %2443 = vmatprep.subr.bf16.mxu0 %v2812_v1 }
  0x2d   :  { %2444 = vmatpush3.bf16.msra.mxu0 %v139_v9 }
  0x2e   :  { %2475 = vmatprep.subr.bf16.mxu0 %v2812_v1 }
  0x94   :  { %v70_v14 = vpop.permute.xlu0 %69 }
  0x95   :  { %vm74_vm2 = vcmp.eq.s32.totalorder %v70_v14, %v67_v13 }
  0x96   :  { %v76_v16 = vsel %vm74_vm2, 1.0, %v2812_v1 }
  0x98   :  { %v73_v15 = vpop.permute.xlu0 %72 }
  0x99   :  { %vm75_vm3 = vcmp.eq.s32.totalorder %v73_v15, %v67_v13 }
  0x9a   :  { %v77_v17 = vsel %vm75_vm3, 1.0, %v2812_v1 }
  0x9b   :  { %v78_v18 = vpack.c.bf16 %v77_v17, %v76_v16 }
  0x9d   :  { %2446 = vmatmul.mubr.msk.bf16.vlgmr.msra.gmra.mrb[0].mxu0 %vm133_vm4, %v78_v18 }
  0x9e   :  { %2477 = vmatprep.mubr.msk.bf16.mxu0 %vm2813_vm1, %v2812_v1 }
 0x170   :  { %v175_v20 = vpop.f32.mrb[0].mxu0 }
 0x171   :  { %v176_v22 = vadd.f32 %v175_v20, %v92_v19  ;;  %v2447_v23 = vpop.f32.mrb[1].mxu0 }
 0x172   :  { %v178_v24 = vpop.f32.mrb[2].mxu0  ;;  %v224_v23 = vld [vmem:[#allocation2] sm:$0x3] }
 0x173   :  { %v179_v25 = vadd.f32 %v178_v24, %v93_v21  ;;  %v2448_v26 = vpop.f32.mrb[3].mxu0  ;;  %v185_v27 = vsel %vm184_vm5, %v176_v22, 0.0  ;;  %v2816_v21 = vmov 1966171168   ;;  %v225_v24 = vsub.f32 1.0, %v224_v23 }
 0x174   :  { %186 = vadd.xlane.f32.xlu1 %v185_v27 }
 0x175   :  { %v188_v28 = vsel %vm184_vm5, %v179_v25, 0.0  ;;  %v226_v26 = vmul.f32 -1e+09, %v225_v24 }
 0x178   :  { %189 = vadd.xlane.f32.xlu1 %v188_v28 }
 0x201   :  { %v187_v29 = vpop.xlane.xlu1 %186 }
 0x202   :  { %v192_v30 = vmul.f32 0.03125, %v187_v29 }
 0x204   :  { %v194_v31 = vsub.f32 %v176_v22, %v192_v30  ;;  %v508_v22 = vunpack.c.l.s4 %v2816_v21 }
 0x205   :  { %v190_v32 = vpop.xlane.xlu1 %189 }
 0x206   :  { %v193_v33 = vmul.f32 0.03125, %v190_v32  ;;  %v196_v34 = vmul.f32 %v194_v31, %v194_v31 }
 0x208   :  { %v195_v35 = vsub.f32 %v179_v25, %v193_v33  ;;  %v198_v36 = vsel %vm184_vm5, %v196_v34, 0.0  ;;  %v509_v25 = vunpack.c.0.s8 %v508_v22 }
 0x209   :  { %199 = vadd.xlane.f32.xlu0 %v198_v36 }
 0x20a   :  { %v197_v37 = vmul.f32 %v195_v35, %v195_v35  ;;  %v512_v27 = vsub.s32 %v509_v25, %v2991_v58 }
 0x20c   :  { %v201_v38 = vsel %vm184_vm5, %v197_v37, 0.0  ;;  %v513_v28 = vrot.slane %v226_v26, %v512_v27 }
 0x20d   :  { %202 = vadd.xlane.f32.xlu1 %v201_v38 }
 0x20e   :  { %v521_v29 = vrot.slane %v513_v28, %v512_v27 }
 0x210   :  { %v3046_v30 = vrot.slane %v521_v29, %v2994_v59 }
 0x296   :  { %v200_v41 = vpop.xlane.xlu0 %199 }
 0x297   :  { %v204_v42 = vmul.f32 0.03125, %v200_v41 }
 0x299   :  { %v206_v43 = vadd.f32 1e-12, %v204_v42 }
 0x29a   :  { %v203_v44 = vpop.xlane.xlu1 %202 }
 0x29b   :  { %2700 = vrsqrt.f32 %v206_v43  ;;  %v205_v45 = vmul.f32 0.03125, %v203_v44 }
 0x29d   :  { %v207_v46 = vadd.f32 1e-12, %v205_v45 }
 0x29f   :  { %2702 = vrsqrt.f32 %v207_v46 }
 0x2a5   :  { %v2701_v47 = vpop.eup %2700 }
 0x2a6   :  { %v210_v48 = vmul.f32 %v2701_v47, %v194_v31  ;;  %v514_v31 = vcombine.high %v513_v28, %v513_v28 }
 0x2a8   :  { %v216_v52 = vmul.f32 %v2276_v49, %v210_v48  ;;  %v528_v38 = vrot.slane %v514_v31, %v512_v27 }
 0x2a9   :  { %v2703_v50 = vpop.eup %2702 }
 0x2aa   :  { %v211_v51 = vmul.f32 %v2703_v50, %v195_v35  ;;  %v2981_v55 = vadd.f32 %v2277_v53, %v216_v52  ;;  %v3051_v40 = vrot.slane %v528_v38, %v2994_v59 }
 0x2ac   :  { %v217_v54 = vmul.f32 %v2276_v49, %v211_v51 }
 0x2ae   :  { %v2983_v56 = vadd.f32 %v2277_v53, %v217_v54 }
 0x2b0   :  { %v228_v57 = vpack.c.bf16 %v2983_v56, %v2981_v55 }
 0x2b2   :  { %2454 = vmatmul.mubr.msk.bf16.vlgmr.msra.gmra.mrb[0].mxu1 %vm184_vm5, %v228_v57 }
 0x2b3   :  { %2459 = vmatprep.mubr.msk.bf16.mxu1 %vm2813_vm1, %v2812_v1 }
 0x385   :  { %v286_v62 = vpop.f32.mrb[0].mxu1 }
 0x386   :  { %v2455_v63 = vpop.f32.mrb[1].mxu1  ;;  %v287_v2 = vadd.f32 %v286_v62, %v236_v61 }
 0x387   :  { %v289_v0 = vpop.f32.mrb[2].mxu1 }
 0x388   :  { %v290_v3 = vadd.f32 %v289_v0, %v236_v61  ;;  %v2456_v4 = vpop.f32.mrb[3].mxu1  ;;  %v3004_v6 = vpack.c.bf16 %v287_v2, %v287_v2 }
 0x38a   :  { %v2657_v5 = vpack.i.bf16 %v290_v3, %v287_v2  ;;  %v3008_v7 = vpack.c.bf16 %v290_v3, %v290_v3 }
 0x38c   :  { %2658 = vrot.lane.b32.xlu1 %v2657_v5, %s2814_s0 }
 0x390   :  { %306 = vrot.lane.b32.xlu1 %v3004_v6, %s2815_s26 }
 0x394   :  { %356 = vrot.lane.b32.xlu1 %v3008_v7, %s2815_s26 }
 0x3fe   :  { %v2659_v8 = vpop.permute.xlu1 %2658 }
 0x3ff   :  { %v2661_v9 = vunpack.i.h.bf16 %v2659_v8  ;;  %v2660_v10 = vunpack.i.l.bf16 %v2659_v8 }
 0x401   :  { %v3012_v11 = vpack.c.bf16 %v2661_v9, %v2661_v9  ;;  %v3014_v12 = vpack.c.bf16 %v2660_v10, %v2660_v10 }
 0x402   :  { %v307_v13 = vpop.permute.xlu1 %306 }
 0x403   :  { %v313_v14 = vsel %vm308_vm6, %v307_v13, 0  ;;  %454 = vrot.lane.b32.xlu0 %v3012_v11, %s2815_s26  ;;  %405 = vrot.lane.b32.xlu1 %v3014_v12, %s2815_s26 }
 0x404   :  { %2458 = vmatpush3.bf16.xpose.msra.mxu1 %v313_v14 }
 0x405   :  { %2463 = vmatprep.subr.bf16.mxu1 %v2812_v1 }
 0x406   :  { %v357_v15 = vpop.permute.xlu1 %356 }
 0x407   :  { %v362_v16 = vsel %vm308_vm6, %v357_v15, 0 }
 0x40b   :  { %2460 = vmatmul.mubr.msk.bf16.vlgmr.msra.gmra.mrb[4].mxu1 %vm308_vm6, %v3004_v6 }
 0x40c   :  { %2464 = vmatpush3.bf16.xpose.msra.mxu1 %v362_v16  ;;  %2465 = vmatprep.mubr.msk.bf16.mxu1 %vm2813_vm1, %v2812_v1 }
 0x40d   :  { %2469 = vmatprep.subr.bf16.mxu1 %v2812_v1 }
 0x413   :  { %2466 = vmatmul.mubr.msk.bf16.vlgmr.msra.gmra.mrb[8].mxu1 %vm308_vm6, %v3008_v7 }
 0x414   :  { %2471 = vmatprep.mubr.msk.bf16.mxu1 %vm2813_vm1, %v2812_v1 }
 0x475   :  { %v455_v17 = vpop.permute.xlu0 %454  ;;  %v406_v18 = vpop.permute.xlu1 %405 }
 0x476   :  { %v460_v19 = vsel %vm308_vm6, %v455_v17, 0  ;;  %v411_v20 = vsel %vm308_vm6, %v406_v18, 0 }
 0x477   :  { %2470 = vmatpush3.bf16.xpose.msra.mxu1 %v411_v20  ;;  %2476 = vmatpush3.bf16.xpose.msra.mxu0 %v460_v19 }
 0x478   :  { %2481 = vmatprep.subr.bf16.mxu1 %v2812_v1  ;;  %2487 = vmatprep.subr.bf16.mxu0 %v2812_v1 }
 0x47e   :  { %2472 = vmatmul.mubr.msk.bf16.vlgmr.msra.gmra.mrb[12].mxu1 %vm308_vm6, %v3014_v12  ;;  %2478 = vmatmul.mubr.msk.bf16.vlgmr.msra.gmra.mrb[4].mxu0 %vm308_vm6, %v3012_v11 }
 0x47f   :  { %2483 = vmatprep.mubr.msk.bf16.mxu1 %vm2813_vm1, %v2812_v1  ;;  %2489 = vmatprep.mubr.msk.bf16.mxu0 %vm2813_vm1, %v2812_v1 }
 0x4de   :  { %v349_v32 = vpop.f32.mrb[4].mxu1 }
 0x4df   :  { %v502_v33 = vmul.f32 0.25, %v349_v32  ;;  %v2461_v34 = vpop.f32.mrb[5].mxu1 }
 0x4e0   :  { %v352_v35 = vpop.f32.mrb[6].mxu1 }
 0x4e1   :  { %v2462_v36 = vpop.f32.mrb[7].mxu1  ;;  %v539_v37 = vadd.f32 %v3046_v30, %v502_v33 }
 0x4e3   :  { %v544_v39 = vsel %vm543_vm7, %v539_v37, -inf }
 0x4e4   :  { %545 = vmax.xlane.f32.xlu1 %v544_v39 }
 0x4e6   :  { %v398_v41 = vpop.f32.mrb[8].mxu1 }
 0x4e7   :  { %v503_v42 = vmul.f32 0.25, %v398_v41  ;;  %v2467_v43 = vpop.f32.mrb[9].mxu1 }
 0x4e8   :  { %v401_v44 = vpop.f32.mrb[10].mxu1 }
 0x4e9   :  { %v2468_v45 = vpop.f32.mrb[11].mxu1  ;;  %v540_v46 = vadd.f32 %v3051_v40, %v503_v42 }
 0x4eb   :  { %v547_v47 = vsel %vm543_vm7, %v540_v46, -inf }
 0x4ec   :  { %548 = vmax.xlane.f32.xlu0 %v547_v47 }
 0x502   :  { %592 = vrot.lane.b32.xlu0 %v3004_v6, %s2817_s27 }
 0x551   :  { %v447_v48 = vpop.f32.mrb[12].mxu1  ;;  %v496_v49 = vpop.f32.mrb[4].mxu0 }
 0x552   :  { %v504_v50 = vmul.f32 0.25, %v447_v48  ;;  %v505_v51 = vmul.f32 0.25, %v496_v49  ;;  %v2473_v52 = vpop.f32.mrb[13].mxu1  ;;  %v2479_v53 = vpop.f32.mrb[5].mxu0 }
 0x553   :  { %v450_v54 = vpop.f32.mrb[14].mxu1  ;;  %v499_v57 = vpop.f32.mrb[6].mxu0 }
 0x554   :  { %v2474_v61 = vpop.f32.mrb[15].mxu1  ;;  %v2480_v62 = vpop.f32.mrb[7].mxu0  ;;  %v541_v63 = vadd.f32 %v3046_v30, %v504_v50  ;;  %v542_v2 = vadd.f32 %v3051_v40, %v505_v51  ;;  %v2678_v51 = vld [vmem:[%s3403_s7 + $0x8] sm:$0xff]  }
 0x556   :  { %v550_v0 = vsel %vm543_vm7, %v541_v63, -inf  ;;  %v553_v3 = vsel %vm543_vm7, %v542_v2, -inf }
 0x557   :  { %551 = vmax.xlane.f32.xlu1 %v550_v0 }
 0x55b   :  { %554 = vmax.xlane.f32.xlu1 %v553_v3 }
 0x56c   :  { %641 = vrot.lane.b32.xlu1 %v3008_v7, %s2817_s27 }
 0x571   :  { %v546_v4 = vpop.xlane.xlu1 %545 }
 0x572   :  { %v556_v6 = vsub.f32 %v539_v37, %v546_v4 }
 0x574   :  { %v560_v9 = vmul.f32 1.442695, %v556_v6 }
 0x576   :  { %2704 = vpow2.f32 %v560_v9 }
 0x579   :  { %v549_v5 = vpop.xlane.xlu0 %548 }
 0x57a   :  { %v557_v10 = vsub.f32 %v540_v46, %v549_v5  ;;  %v2677_v46 = vld [vmem:[%s3403_s7] sm:$0xff]  }
 0x57c   :  { %v562_v14 = vmul.f32 1.442695, %v557_v10 }
 0x57d   :  { %v593_v8 = vpop.permute.xlu0 %592 }
 0x57e   :  { %v599_v13 = vsel %vm597_vm8, %v593_v8, 0  ;;  %2706 = vpow2.f32 %v562_v14 }
 0x57f   :  { %2482 = vmatpush3.bf16.msra.mxu1 %v599_v13 }
 0x580   :  { %2493 = vmatprep.subr.bf16.mxu1 %v2812_v1  ;;  %v2705_v15 = vpop.eup %2704 }
 0x581   :  { %v568_v16 = vsel %vm543_vm7, %v2705_v15, 0.0 }
 0x588   :  { %v2707_v17 = vpop.eup %2706 }
 0x589   :  { %v571_v7 = vsel %vm543_vm7, %v2707_v17, 0.0 }
 0x590   :  { %569 = vadd.xlane.f32.xlu1 %v568_v16 }
 0x594   :  { %572 = vadd.xlane.f32.xlu1 %v571_v7 }
 0x5e4   :  { %v552_v18 = vpop.xlane.xlu1 %551 }
 0x5e5   :  { %v558_v19 = vsub.f32 %v541_v63, %v552_v18  ;;  %v3106_v18 = vsub.s32 1, %v2991_v58 }
 0x5e7   :  { %v564_v20 = vmul.f32 1.442695, %v558_v19  ;;  %v843_v19 = vrot.slane %v2999_v60, %v3106_v18 }
 0x5e8   :  { %v555_v21 = vpop.xlane.xlu1 %554 }
 0x5e9   :  { %2708 = vpow2.f32 %v564_v20  ;;  %v559_v22 = vsub.f32 %v542_v2, %v555_v21 }
 0x5eb   :  { %v566_v23 = vmul.f32 1.442695, %v559_v22 }
 0x5ec   :  { %v642_v24 = vpop.permute.xlu1 %641 }
 0x5ed   :  { %2710 = vpow2.f32 %v566_v23  ;;  %v647_v25 = vsel %vm597_vm8, %v642_v24, 0 }
 0x5ee   :  { %2488 = vmatpush3.bf16.msra.mxu0 %v647_v25 }
 0x5ef   :  { %2499 = vmatprep.subr.bf16.mxu0 %v2812_v1 }
 0x5f3   :  { %v2709_v26 = vpop.eup %2708 }
 0x5f4   :  { %v574_v27 = vsel %vm543_vm7, %v2709_v26, 0.0 }
 0x5f5   :  { %575 = vadd.xlane.f32.xlu0 %v574_v27 }
 0x5f7   :  { %v2711_v28 = vpop.eup %2710 }
 0x5f8   :  { %v577_v29 = vsel %vm543_vm7, %v2711_v28, 0.0 }
 0x5f9   :  { %578 = vadd.xlane.f32.xlu1 %v577_v29 }
 0x60a   :  { %689 = vrot.lane.b32.xlu1 %v3014_v12, %s2817_s27 }
 0x60b   :  { %737 = vrot.lane.b32.xlu0 %v3012_v11, %s2817_s27 }
 0x61d   :  { %v570_v31 = vpop.xlane.xlu1 %569 }
 0x61e   :  { %2712 = vrcp.f32 %v570_v31 }
 0x621   :  { %v573_v32 = vpop.xlane.xlu1 %572 }
 0x622   :  { %2714 = vrcp.f32 %v573_v32 }
 0x628   :  { %v2713_v33 = vpop.eup %2712 }
 0x629   :  { %v584_v34 = vmul.f32 %v2713_v33, %v2705_v15 }
 0x62b   :  { %v588_v35 = vpack.c.bf16 %v584_v34, %v584_v34 }
 0x62c   :  { %v2715_v36 = vpop.eup %2714 }
 0x62d   :  { %v585_v37 = vmul.f32 %v2715_v36, %v2707_v17  ;;  %2484 = vmatmul.mubr.msk.bf16.vlgmr.msra.gmra.mrb[16].mxu1 %vm543_vm7, %v588_v35 }
 0x62e   :  { %2495 = vmatprep.mubr.msk.bf16.mxu1 %vm2813_vm1, %v2812_v1 }
 0x62f   :  { %v589_v38 = vpack.c.bf16 %v585_v37, %v585_v37 }
 0x631   :  { %2490 = vmatmul.mubr.msk.bf16.vlgmr.msra.gmra.mrb[8].mxu0 %vm543_vm7, %v589_v38 }
 0x632   :  { %2501 = vmatprep.mubr.msk.bf16.mxu0 %vm2813_vm1, %v2812_v1 }
 0x682   :  { %v576_v11 = vpop.xlane.xlu0 %575 }
 0x683   :  { %2716 = vrcp.f32 %v576_v11 }
 0x686   :  { %v738_v12 = vpop.permute.xlu0 %737  ;;  %v579_v39 = vpop.xlane.xlu1 %578 }
 0x687   :  { %v743_v41 = vsel %vm597_vm8, %v738_v12, 0  ;;  %2718 = vrcp.f32 %v579_v39 }
 0x688   :  { %2500 = vmatpush3.bf16.msra.mxu0 %v743_v41  ;;  %v2680_v41 = vld [vmem:[%s3404_s8 + $0x8] sm:$0xff]  }
 0x689   :  { %2511 = vmatprep.subr.bf16.mxu0 %v2812_v1 }
 0x68a   :  { %v690_v42 = vpop.permute.xlu1 %689 }
 0x68b   :  { %v695_v43 = vsel %vm597_vm8, %v690_v42, 0 }
 0x68c   :  { %2494 = vmatpush3.bf16.msra.mxu1 %v695_v43 }
 0x68d   :  { %v2717_v44 = vpop.eup %2716  ;;  %2505 = vmatprep.subr.bf16.mxu1 %v2812_v1 }
 0x68e   :  { %v586_v45 = vmul.f32 %v2717_v44, %v2709_v26 }
 0x690   :  { %v590_v47 = vpack.c.bf16 %v586_v45, %v586_v45 }
 0x691   :  { %v2719_v48 = vpop.eup %2718 }
 0x692   :  { %v587_v49 = vmul.f32 %v2719_v48, %v2711_v28  ;;  %2496 = vmatmul.mubr.msk.bf16.vlgmr.msra.gmra.mrb[20].mxu1 %vm543_vm7, %v590_v47  ;;  %v3125_v48 = vsub.s32 4, %v2991_v58 }
 0x693   :  { %2506 = vmatpush3.bf16.msra.mxu1 %v2677_v46  ;;  %2507 = vmatprep.mubr.msk.bf16.mxu1 %vm2813_vm1, %v2812_v1 }
 0x694   :  { %v591_v50 = vpack.c.bf16 %v587_v49, %v587_v49  ;;  %2517 = vmatprep.subr.bf16.mxu1 %v2812_v1  ;;  %v930_v49 = vrot.slane %v2999_v60, %v3125_v48 }
 0x696   :  { %2502 = vmatmul.mubr.msk.bf16.vlgmr.msra.gmra.mrb[12].mxu0 %vm543_vm7, %v591_v50  ;;  %v3130_v50 = vsub.s32 5, %v2991_v58 }
 0x697   :  { %2513 = vmatprep.mubr.msk.bf16.mxu0 %vm2813_vm1, %v2812_v1  ;;  %2512 = vmatpush3.bf16.msra.mxu0 %v2678_v51 }
 0x698   :  { %2525 = vmatprep.subr.bf16.mxu0 %v2812_v1 }
 0x700   :  { %v635_v52 = vpop.f32.mrb[16].mxu1 }
 0x701   :  { %v2485_v53 = vpop.f32.mrb[17].mxu1 }
 0x702   :  { %v638_v54 = vpop.f32.mrb[18].mxu1 }
 0x703   :  { %v2486_v57 = vpop.f32.mrb[19].mxu1 }
 0x704   :  { %v683_v61 = vpop.f32.mrb[8].mxu0 }
 0x705   :  { %v789_v62 = vpack.c.bf16 %v683_v61, %v635_v52  ;;  %v2491_v63 = vpop.f32.mrb[9].mxu0  ;;  %v936_v61 = vrot.slane %v2999_v60, %v3130_v50 }
 0x706   :  { %v686_v0 = vpop.f32.mrb[10].mxu0 }
 0x707   :  { %v2492_v2 = vpop.f32.mrb[11].mxu0  ;;  %2508 = vmatmul.mubr.msk.bf16.vlgmr.msra.gmra.mrb[24].mxu1 %vm308_vm6, %v789_v62 }
 0x708   :  { %2521 = vmatprep.mubr.msk.bf16.mxu1 %vm2813_vm1, %v2812_v1 }
 0x765   :  { %v731_v3 = vpop.f32.mrb[20].mxu1 }
 0x766   :  { %v2497_v4 = vpop.f32.mrb[21].mxu1 }
 0x767   :  { %v734_v5 = vpop.f32.mrb[22].mxu1  ;;  %v2682_v4 = vld [vmem:[%s3405_s9 + $0x8] sm:$0xff]  }
 0x768   :  { %v2498_v6 = vpop.f32.mrb[23].mxu1  ;;  %v2683_v5 = vld [vmem:[%s3405_s9 + $0x10] sm:$0xff]  }
 0x769   :  { %v779_v8 = vpop.f32.mrb[12].mxu0  ;;  %v2684_v6 = vld [vmem:[%s3405_s9 + $0x18] sm:$0xff]  }
 0x76a   :  { %v846_v9 = vpack.c.bf16 %v779_v8, %v731_v3  ;;  %v2503_v10 = vpop.f32.mrb[13].mxu0  ;;  %v2681_v3 = vld [vmem:[%s3405_s9] sm:$0xff]   ;;  %v3154_v8 = vsub.s32 2, %v2991_v58 }
 0x76b   :  { %v782_v13 = vpop.f32.mrb[14].mxu0 }
 0x76c   :  { %v2504_v14 = vpop.f32.mrb[15].mxu0  ;;  %2514 = vmatmul.mubr.msk.bf16.vlgmr.msra.gmra.mrb[16].mxu0 %vm308_vm6, %v846_v9  ;;  %v947_v9 = vrot.slane %v2999_v60, %v3154_v8 }
 0x76d   :  { %2533 = vmatprep.mubr.msk.bf16.mxu0 %vm2813_vm1, %v2812_v1  ;;  %2526 = vmatpush3.bf16.msra.mxu0 %v2681_v3 }
 0x76e   :  { %2527 = vmatprep.subr.bf16.mxu0 %v2812_v1 }
 0x771   :  { %2528 = vmatpush3.bf16.msra.mxu0 %v2682_v4 }
 0x772   :  { %2529 = vmatprep.subr.bf16.mxu0 %v2812_v1 }
 0x775   :  { %2530 = vmatpush3.bf16.msra.mxu0 %v2683_v5 }
 0x776   :  { %2531 = vmatprep.subr.bf16.mxu0 %v2812_v1 }
 0x779   :  { %2532 = vmatpush3.bf16.msra.mxu0 %v2684_v6 }
 0x77a   :  { %2551 = vmatprep.subr.bf16.mxu0 %v2812_v1 }
 0x7da   :  { %v833_v15 = vpop.f32.mrb[24].mxu1 }
 0x7db   :  { %v2509_v16 = vpop.f32.mrb[25].mxu1  ;;  %v844_v20 = vadd.f32 %v843_v19, %v833_v15 }
 0x7dc   :  { %v836_v17 = vpop.f32.mrb[26].mxu1 }
 0x7dd   :  { %v2510_v7 = vpop.f32.mrb[27].mxu1  ;;  %v845_v22 = vadd.f32 %v843_v19, %v836_v17 }
 0x83f   :  { %v890_v21 = vpop.f32.mrb[16].mxu0 }
 0x840   :  { %v897_v23 = vadd.f32 %v890_v21, %v844_v20  ;;  %v2515_v24 = vpop.f32.mrb[17].mxu0 }
 0x841   :  { %v893_v25 = vpop.f32.mrb[18].mxu0 }
 0x842   :  { %v898_v26 = vadd.f32 %v893_v25, %v845_v22  ;;  %v2516_v27 = vpop.f32.mrb[19].mxu0  ;;  %v899_v28 = vadd.f32 %v897_v23, %v2981_v55 }
 0x844   :  { %v901_v29 = vsel %vm184_vm5, %v899_v28, 0.0  ;;  %v900_v31 = vadd.f32 %v898_v26, %v2983_v56  ;;  %v2679_v56 = vld [vmem:[%s3404_s8] sm:$0xff]  }
 0x845   :  { %902 = vadd.xlane.f32.xlu1 %v901_v29  ;;  %2518 = vmatpush3.bf16.msra.mxu1 %v2679_v56 }
 0x846   :  { %v904_v32 = vsel %vm184_vm5, %v900_v31, 0.0  ;;  %2519 = vmatprep.subr.bf16.mxu1 %v2812_v1 }
 0x847   :  { %905 = vadd.xlane.f32.xlu0 %v904_v32 }
 0x849   :  { %2520 = vmatpush3.bf16.msra.mxu1 %v2680_v41 }
 0x84a   :  { %2537 = vmatprep.subr.bf16.mxu1 %v2812_v1 }
 0x8d2   :  { %v903_v33 = vpop.xlane.xlu1 %902 }
 0x8d3   :  { %v907_v34 = vmul.f32 0.03125, %v903_v33 }
 0x8d4   :  { %v906_v35 = vpop.xlane.xlu0 %905 }
 0x8d5   :  { %v909_v36 = vsub.f32 %v899_v28, %v907_v34  ;;  %v908_v37 = vmul.f32 0.03125, %v906_v35 }
 0x8d7   :  { %v910_v38 = vsub.f32 %v900_v31, %v908_v37  ;;  %v911_v11 = vmul.f32 %v909_v36, %v909_v36 }
 0x8d9   :  { %v913_v12 = vsel %vm184_vm5, %v911_v11, 0.0  ;;  %v912_v39 = vmul.f32 %v910_v38, %v910_v38 }
 0x8da   :  { %914 = vadd.xlane.f32.xlu0 %v913_v12 }
 0x8db   :  { %v916_v55 = vsel %vm184_vm5, %v912_v39, 0.0 }
 0x8dc   :  { %917 = vadd.xlane.f32.xlu1 %v916_v55 }
 0x967   :  { %v915_v42 = vpop.xlane.xlu0 %914 }
 0x968   :  { %v919_v43 = vmul.f32 0.03125, %v915_v42 }
 0x969   :  { %v918_v44 = vpop.xlane.xlu1 %917 }
 0x96a   :  { %v921_v45 = vadd.f32 1e-12, %v919_v43  ;;  %v920_v46 = vmul.f32 0.03125, %v918_v44 }
 0x96c   :  { %2720 = vrsqrt.f32 %v921_v45  ;;  %v922_v47 = vadd.f32 1e-12, %v920_v46 }
 0x96e   :  { %2722 = vrsqrt.f32 %v922_v47 }
 0x976   :  { %v2721_v51 = vpop.eup %2720 }
 0x977   :  { %v925_v52 = vmul.f32 %v2721_v51, %v909_v36 }
 0x978   :  { %v2723_v53 = vpop.eup %2722 }
 0x979   :  { %v931_v54 = vmul.f32 %v930_v49, %v925_v52  ;;  %v926_v57 = vmul.f32 %v2723_v53, %v910_v38  ;;  %v3162_v38 = vsub.s32 3, %v2991_v58 }
 0x97b   :  { %v932_v62 = vmul.f32 %v930_v49, %v926_v57  ;;  %v937_v63 = vadd.f32 %v936_v61, %v931_v54  ;;  %v1034_v11 = vrot.slane %v2999_v60, %v3162_v38 }
 0x97d   :  { %v938_v0 = vadd.f32 %v936_v61, %v932_v62 }
 0x97f   :  { %v939_v2 = vpack.c.bf16 %v938_v0, %v937_v63 }
 0x981   :  { %2522 = vmatmul.mubr.msk.bf16.vlgmr.msra.gmra.mrb[28].mxu1 %vm184_vm5, %v939_v2  ;;  %v2686_v2 = vld [vmem:[%s3402_s6 + $0x18] sm:$0xff]  }
 0x982   :  { %2541 = vmatprep.mubr.msk.bf16.mxu1 %vm2813_vm1, %v2812_v1 }
 0xa54   :  { %v997_v10 = vpop.f32.mrb[28].mxu1 }
 0xa55   :  { %v998_v13 = vadd.f32 %v997_v10, %v947_v9  ;;  %v2523_v14 = vpop.f32.mrb[29].mxu1 }
 0xa56   :  { %v1000_v15 = vpop.f32.mrb[30].mxu1 }
 0xa57   :  { %v1004_v16 = vmul.f32 %v998_v13, %v998_v13  ;;  %v1001_v17 = vadd.f32 %v1000_v15, %v947_v9  ;;  %v2524_v7 = vpop.f32.mrb[31].mxu1  ;;  %v1140_v15 = vsub.s32 7, %v2991_v58 }
 0xa59   :  { %v1006_v19 = vmul.f32 %v1004_v16, %v998_v13  ;;  %v1005_v20 = vmul.f32 %v1001_v17, %v1001_v17 }
 0xa5b   :  { %v1008_v21 = vmul.f32 0.044715, %v1006_v19  ;;  %v1007_v22 = vmul.f32 %v1005_v20, %v1001_v17 }
 0xa5d   :  { %v1010_v23 = vadd.f32 %v1008_v21, %v998_v13  ;;  %v1009_v24 = vmul.f32 0.044715, %v1007_v22  ;;  %v1141_v21 = vrot.slane %v2999_v60, %v1140_v15 }
 0xa5f   :  { %v1012_v25 = vmul.f32 0.7978846, %v1010_v23  ;;  %v1011_v26 = vadd.f32 %v1009_v24, %v1001_v17 }
 0xa61   :  { %2724 = vtanh.f32 %v1012_v25  ;;  %v1013_v27 = vmul.f32 0.7978846, %v1011_v26  ;;  %v3198_v26 = vld [vmem:[%s3406_s10 + $0x8] sm:$0xff] }
 0xa63   :  { %2726 = vtanh.f32 %v1013_v27 }
 0xa6b   :  { %v2725_v28 = vpop.eup %2724 }
 0xa6c   :  { %v1016_v29 = vadd.f32 1.0, %v2725_v28 }
 0xa6d   :  { %v2727_v31 = vpop.eup %2726 }
 0xa6e   :  { %v1018_v32 = vmul.f32 0.5, %v1016_v29  ;;  %v1017_v33 = vadd.f32 1.0, %v2727_v31 }
 0xa70   :  { %v1019_v34 = vmul.f32 0.5, %v1017_v33  ;;  %v1020_v35 = vmul.f32 %v1018_v32, %v998_v13  ;;  %v1134_v13 = vsub.s32 6, %v2991_v58  ;;  %v2697_v58 = vld [vmem:[%s3408_s12] sm:$0xff]  }
 0xa72   :  { %v1021_v36 = vmul.f32 %v1019_v34, %v1001_v17  ;;  %v1135_v14 = vrot.slane %v2999_v60, %v1134_v13  ;;  %v1155_v60 = vrot.slane %v3198_v26, %v2994_v59 }
 0xa74   :  { %v1022_v37 = vpack.c.bf16 %v1021_v36, %v1020_v35 }
 0xa76   :  { %2534 = vmatmul.mubr.msk.bf16.vlgmr.msra.gmra.mrb[20].mxu0 %vm1059_vm9, %v1022_v37 }
 0xa77   :  { %2553 = vmatprep.mubr.msk.bf16.mxu0 %vm2813_vm1, %v2812_v1 }
 0xb49   :  { %v1097_v12 = vpop.f32.mrb[20].mxu0 }
 0xb4a   :  { %v1098_v39 = vadd.f32 %v1097_v12, %v1034_v11  ;;  %v2535_v55 = vpop.f32.mrb[21].mxu0 }
 0xb4b   :  { %v1100_v56 = vpop.f32.mrb[22].mxu0 }
 0xb4c   :  { %v1101_v41 = vadd.f32 %v1100_v56, %v1034_v11  ;;  %v2536_v42 = vpop.f32.mrb[23].mxu0  ;;  %v1104_v43 = vadd.f32 %v1098_v39, %v937_v63 }
 0xb4e   :  { %v1106_v44 = vsel %vm184_vm5, %v1104_v43, 0.0  ;;  %v1105_v45 = vadd.f32 %v1101_v41, %v938_v0  ;;  %v2685_v0 = vld [vmem:[%s3402_s6 + $0x10] sm:$0xff]  }
 0xb4f   :  { %1107 = vadd.xlane.f32.xlu0 %v1106_v44  ;;  %2538 = vmatpush3.bf16.msra.mxu1 %v2685_v0 }
 0xb50   :  { %v1109_v46 = vsel %vm184_vm5, %v1105_v45, 0.0  ;;  %2539 = vmatprep.subr.bf16.mxu1 %v2812_v1 }
 0xb51   :  { %1110 = vadd.xlane.f32.xlu1 %v1109_v46 }
 0xb53   :  { %2540 = vmatpush3.bf16.msra.mxu1 %v2686_v2 }
 0xb54   :  { %2545 = vmatprep.subr.bf16.mxu1 %v2812_v1 }
 0xbdc   :  { %v1108_v47 = vpop.xlane.xlu0 %1107 }
 0xbdd   :  { %v1112_v49 = vmul.f32 0.03125, %v1108_v47 }
 0xbde   :  { %v1111_v51 = vpop.xlane.xlu1 %1110 }
 0xbdf   :  { %v1114_v52 = vsub.f32 %v1104_v43, %v1112_v49  ;;  %v1113_v53 = vmul.f32 0.03125, %v1111_v51 }
 0xbe1   :  { %v1115_v54 = vsub.f32 %v1105_v45, %v1113_v53  ;;  %v1116_v57 = vmul.f32 %v1114_v52, %v1114_v52 }
 0xbe3   :  { %v1118_v61 = vsel %vm184_vm5, %v1116_v57, 0.0  ;;  %v1117_v62 = vmul.f32 %v1115_v54, %v1115_v54 }
 0xbe4   :  { %1119 = vadd.xlane.f32.xlu0 %v1118_v61 }
 0xbe5   :  { %v1121_v63 = vsel %vm184_vm5, %v1117_v62, 0.0 }
 0xbe6   :  { %1122 = vadd.xlane.f32.xlu1 %v1121_v63 }
 0xc71   :  { %v1120_v3 = vpop.xlane.xlu0 %1119 }
 0xc72   :  { %v1124_v4 = vmul.f32 0.03125, %v1120_v3 }
 0xc73   :  { %v1123_v5 = vpop.xlane.xlu1 %1122 }
 0xc74   :  { %v1126_v6 = vadd.f32 1e-12, %v1124_v4  ;;  %v1125_v9 = vmul.f32 0.03125, %v1123_v5 }
 0xc76   :  { %2728 = vrsqrt.f32 %v1126_v6  ;;  %v1127_v10 = vadd.f32 1e-12, %v1125_v9 }
 0xc78   :  { %2730 = vrsqrt.f32 %v1127_v10 }
 0xc80   :  { %v2729_v16 = vpop.eup %2728 }
 0xc81   :  { %v1130_v17 = vmul.f32 %v2729_v16, %v1114_v52 }
 0xc82   :  { %v2731_v7 = vpop.eup %2730 }
 0xc83   :  { %v1136_v19 = vmul.f32 %v1135_v14, %v1130_v17  ;;  %v1131_v20 = vmul.f32 %v2731_v7, %v1115_v54 }
 0xc85   :  { %v1137_v22 = vmul.f32 %v1135_v14, %v1131_v20  ;;  %v3186_v23 = vadd.f32 %v1141_v21, %v1136_v19 }
 0xc87   :  { %v3188_v24 = vadd.f32 %v1141_v21, %v1137_v22 }
 0xc89   :  { %v1146_v25 = vpack.c.bf16 %v3188_v24, %v3186_v23 }
 0xc8b   :  { %2542 = vmatmul.mubr.msk.bf16.vlgmr.msra.gmra.mrb[32].mxu1 %vm184_vm5, %v1146_v25 }
 0xc8c   :  { %2547 = vmatprep.mubr.msk.bf16.mxu1 %vm2813_vm1, %v2812_v1 }
 0xd5e   :  { %v1205_v27 = vpop.f32.mrb[32].mxu1 }
 0xd5f   :  { %v1206_v28 = vadd.f32 %v1205_v27, %v1155_v60  ;;  %v2543_v29 = vpop.f32.mrb[33].mxu1 }
 0xd60   :  { %v1208_v31 = vpop.f32.mrb[34].mxu1 }
 0xd61   :  { %v1220_v32 = vpack.c.bf16 %v1206_v28, %v1206_v28  ;;  %v1209_v33 = vadd.f32 %v1208_v31, %v1155_v60  ;;  %v2544_v34 = vpop.f32.mrb[35].mxu1 }
 0xd63   :  { %v2662_v35 = vpack.i.bf16 %v1209_v33, %v1206_v28  ;;  %1225 = vrot.lane.b32.xlu1 %v1220_v32, %s2815_s26  ;;  %v3203_v36 = vpack.c.bf16 %v1209_v33, %v1209_v33 }
 0xd65   :  { %2663 = vrot.lane.b32.xlu0 %v2662_v35, %s2814_s0 }
 0xd67   :  { %1274 = vrot.lane.b32.xlu1 %v3203_v36, %s2815_s26 }
 0xdd5   :  { %v1226_v37 = vpop.permute.xlu1 %1225 }
 0xdd6   :  { %v1231_v11 = vsel %vm308_vm6, %v1226_v37, 0 }
 0xdd7   :  { %2546 = vmatpush3.bf16.xpose.msra.mxu1 %v1231_v11  ;;  %v2664_v12 = vpop.permute.xlu0 %2663 }
 0xdd8   :  { %v2666_v39 = vunpack.i.h.bf16 %v2664_v12  ;;  %v2665_v55 = vunpack.i.l.bf16 %v2664_v12  ;;  %2557 = vmatprep.subr.bf16.mxu1 %v2812_v1 }
 0xdd9   :  { %v1275_v56 = vpop.permute.xlu1 %1274 }
 0xdda   :  { %v3210_v41 = vpack.c.bf16 %v2666_v39, %v2666_v39  ;;  %v3212_v42 = vpack.c.bf16 %v2665_v55, %v2665_v55  ;;  %v1280_v43 = vsel %vm308_vm6, %v1275_v56, 0 }
 0xddb   :  { %2552 = vmatpush3.bf16.xpose.msra.mxu0 %v1280_v43 }
 0xddc   :  { %1323 = vrot.lane.b32.xlu0 %v3212_v42, %s2815_s26  ;;  %1372 = vrot.lane.b32.xlu1 %v3210_v41, %s2815_s26 }
 0xddd   :  { %2563 = vmatprep.subr.bf16.mxu0 %v2812_v1 }
 0xdde   :  { %2548 = vmatmul.mubr.msk.bf16.vlgmr.msra.gmra.mrb[36].mxu1 %vm308_vm6, %v1220_v32 }
 0xddf   :  { %2559 = vmatprep.mubr.msk.bf16.mxu1 %vm2813_vm1, %v2812_v1 }
 0xde2   :  { %2554 = vmatmul.mubr.msk.bf16.vlgmr.msra.gmra.mrb[24].mxu0 %vm308_vm6, %v3203_v36 }
 0xde3   :  { %2565 = vmatprep.mubr.msk.bf16.mxu0 %vm2813_vm1, %v2812_v1 }
 0xe4e   :  { %v1324_v44 = vpop.permute.xlu0 %1323  ;;  %v1373_v45 = vpop.permute.xlu1 %1372 }
 0xe4f   :  { %v1329_v46 = vsel %vm308_vm6, %v1324_v44, 0  ;;  %v1378_v47 = vsel %vm308_vm6, %v1373_v45, 0 }
 0xe50   :  { %2558 = vmatpush3.bf16.xpose.msra.mxu1 %v1329_v46  ;;  %2564 = vmatpush3.bf16.xpose.msra.mxu0 %v1378_v47 }
 0xe51   :  { %2569 = vmatprep.subr.bf16.mxu1 %v2812_v1  ;;  %2575 = vmatprep.subr.bf16.mxu0 %v2812_v1 }
 0xe57   :  { %2560 = vmatmul.mubr.msk.bf16.vlgmr.msra.gmra.mrb[40].mxu1 %vm308_vm6, %v3212_v42  ;;  %2566 = vmatmul.mubr.msk.bf16.vlgmr.msra.gmra.mrb[28].mxu0 %vm308_vm6, %v3210_v41 }
 0xe58   :  { %2571 = vmatprep.mubr.msk.bf16.mxu1 %vm2813_vm1, %v2812_v1  ;;  %2577 = vmatprep.mubr.msk.bf16.mxu0 %vm2813_vm1, %v2812_v1 }
 0xeb1   :  { %v1267_v49 = vpop.f32.mrb[36].mxu1 }
 0xeb2   :  { %v1420_v51 = vmul.f32 0.25, %v1267_v49  ;;  %v2549_v52 = vpop.f32.mrb[37].mxu1 }
 0xeb3   :  { %v1270_v53 = vpop.f32.mrb[38].mxu1 }
 0xeb4   :  { %v2550_v54 = vpop.f32.mrb[39].mxu1  ;;  %v1424_v57 = vadd.f32 %v1420_v51, %v3046_v30 }
 0xeb5   :  { %v1316_v61 = vpop.f32.mrb[24].mxu0 }
 0xeb6   :  { %v1421_v62 = vmul.f32 0.25, %v1316_v61  ;;  %v2555_v63 = vpop.f32.mrb[25].mxu0  ;;  %v1428_v0 = vsel %vm543_vm7, %v1424_v57, -inf }
 0xeb7   :  { %1429 = vmax.xlane.f32.xlu0 %v1428_v0  ;;  %v1319_v2 = vpop.f32.mrb[26].mxu0 }
 0xeb8   :  { %v2556_v3 = vpop.f32.mrb[27].mxu0  ;;  %v1425_v4 = vadd.f32 %v1421_v62, %v3051_v40 }
 0xeba   :  { %v1431_v5 = vsel %vm543_vm7, %v1425_v4, -inf }
 0xebb   :  { %1432 = vmax.xlane.f32.xlu1 %v1431_v5 }
 0xecc   :  { %1476 = vrot.lane.b32.xlu1 %v1220_v32, %s2817_s27 }
 0xf2a   :  { %v1365_v6 = vpop.f32.mrb[40].mxu1  ;;  %v1414_v9 = vpop.f32.mrb[28].mxu0 }
 0xf2b   :  { %v1422_v10 = vmul.f32 0.25, %v1365_v6  ;;  %v1423_v14 = vmul.f32 0.25, %v1414_v9  ;;  %v2561_v16 = vpop.f32.mrb[41].mxu1  ;;  %v2567_v17 = vpop.f32.mrb[29].mxu0 }
 0xf2c   :  { %v1368_v7 = vpop.f32.mrb[42].mxu1  ;;  %v1417_v19 = vpop.f32.mrb[30].mxu0 }
 0xf2d   :  { %v2562_v20 = vpop.f32.mrb[43].mxu1  ;;  %v2568_v21 = vpop.f32.mrb[31].mxu0  ;;  %v1426_v22 = vadd.f32 %v1422_v10, %v3046_v30  ;;  %v1427_v60 = vadd.f32 %v1423_v14, %v3051_v40  ;;  %v2687_v19 = vld [vmem:[%s3403_s7 + $0x10] sm:$0xff]  }
 0xf2e   :  { %v2688_v20 = vld [vmem:[%s3403_s7 + $0x18] sm:$0xff]  }
 0xf2f   :  { %v1434_v25 = vsel %vm543_vm7, %v1426_v22, -inf  ;;  %v1437_v27 = vsel %vm543_vm7, %v1427_v60, -inf }
 0xf30   :  { %1435 = vmax.xlane.f32.xlu0 %v1434_v25 }
 0xf34   :  { %1438 = vmax.xlane.f32.xlu0 %v1437_v27 }
 0xf44   :  { %v1430_v28 = vpop.xlane.xlu0 %1429 }
 0xf45   :  { %v1440_v29 = vsub.f32 %v1424_v57, %v1430_v28 }
 0xf47   :  { %v1444_v31 = vmul.f32 1.442695, %v1440_v29 }
 0xf48   :  { %v1433_v32 = vpop.xlane.xlu1 %1432 }
 0xf49   :  { %2732 = vpow2.f32 %v1444_v31  ;;  %v1441_v33 = vsub.f32 %v1425_v4, %v1433_v32 }
 0xf4b   :  { %v1446_v34 = vmul.f32 1.442695, %v1441_v33 }
 0xf4c   :  { %v1477_v35 = vpop.permute.xlu1 %1476 }
 0xf4d   :  { %2734 = vpow2.f32 %v1446_v34  ;;  %v1482_v37 = vsel %vm597_vm8, %v1477_v35, 0 }
 0xf4e   :  { %2570 = vmatpush3.bf16.msra.mxu1 %v1482_v37 }
 0xf4f   :  { %2581 = vmatprep.subr.bf16.mxu1 %v2812_v1 }
 0xf53   :  { %v2733_v30 = vpop.eup %2732 }
 0xf54   :  { %v1452_v40 = vsel %vm543_vm7, %v2733_v30, 0.0 }
 0xf55   :  { %1453 = vadd.xlane.f32.xlu1 %v1452_v40 }
 0xf57   :  { %v2735_v11 = vpop.eup %2734 }
 0xf58   :  { %v1455_v12 = vsel %vm543_vm7, %v2735_v11, 0.0 }
 0xf59   :  { %1456 = vadd.xlane.f32.xlu0 %v1455_v12 }
 0xfbd   :  { %v1436_v39 = vpop.xlane.xlu0 %1435 }
 0xfbe   :  { %v1442_v55 = vsub.f32 %v1426_v22, %v1436_v39 }
 0xfc0   :  { %v1448_v56 = vmul.f32 1.442695, %v1442_v55 }
 0xfc1   :  { %v1439_v43 = vpop.xlane.xlu0 %1438 }
 0xfc2   :  { %2736 = vpow2.f32 %v1448_v56  ;;  %v1443_v44 = vsub.f32 %v1427_v60, %v1439_v43 }
 0xfc4   :  { %v1450_v45 = vmul.f32 1.442695, %v1443_v44  ;;  %v1727_v44 = vrot.slane %v3198_v26, %v3106_v18 }
 0xfc6   :  { %2738 = vpow2.f32 %v1450_v45 }
 0xfcc   :  { %v2737_v46 = vpop.eup %2736 }
 0xfcd   :  { %v1458_v47 = vsel %vm543_vm7, %v2737_v46, 0.0 }
 0xfce   :  { %1459 = vadd.xlane.f32.xlu1 %v1458_v47 }
 0xfd0   :  { %v2739_v49 = vpop.eup %2738 }
 0xfd1   :  { %v1461_v51 = vsel %vm543_vm7, %v2739_v49, 0.0 }
 0xfd2   :  { %1462 = vadd.xlane.f32.xlu0 %v1461_v51 }
 0xfdf   :  { %1572 = vrot.lane.b32.xlu1 %v3212_v42, %s2817_s27 }
 0xfe2   :  { %v1454_v52 = vpop.xlane.xlu1 %1453 }
 0xfe3   :  { %2740 = vrcp.f32 %v1454_v52  ;;  %1620 = vrot.lane.b32.xlu1 %v3210_v41, %s2817_s27 }
 0xfe6   :  { %v1457_v61 = vpop.xlane.xlu0 %1456 }
 0xfe7   :  { %2742 = vrcp.f32 %v1457_v61 }
 0xfe8   :  { %1524 = vrot.lane.b32.xlu0 %v3203_v36, %s2817_s27 }
 0xfed   :  { %v2741_v53 = vpop.eup %2740 }
 0xfee   :  { %v1468_v54 = vmul.f32 %v2741_v53, %v2733_v30 }
 0xff0   :  { %v1472_v57 = vpack.c.bf16 %v1468_v54, %v1468_v54 }
 0xff1   :  { %v2743_v42 = vpop.eup %2742 }
 0xff2   :  { %2572 = vmatmul.mubr.msk.bf16.vlgmr.msra.gmra.mrb[44].mxu1 %vm543_vm7, %v1472_v57  ;;  %v1469_v36 = vmul.f32 %v2743_v42, %v2735_v11 }
 0xff3   :  { %2583 = vmatprep.mubr.msk.bf16.mxu1 %vm2813_vm1, %v2812_v1 }
 0xff4   :  { %v1473_v6 = vpack.c.bf16 %v1469_v36, %v1469_v36 }
0x105b   :  { %v1460_v62 = vpop.xlane.xlu1 %1459 }
0x105c   :  { %2744 = vrcp.f32 %v1460_v62 }
0x105f   :  { %v1573_v63 = vpop.permute.xlu1 %1572  ;;  %v1463_v0 = vpop.xlane.xlu0 %1462 }
0x1060   :  { %v1578_v41 = vsel %vm597_vm8, %v1573_v63, 0  ;;  %2746 = vrcp.f32 %v1463_v0 }
0x1061   :  { %2582 = vmatpush3.bf16.msra.mxu1 %v1578_v41 }
0x1062   :  { %2593 = vmatprep.subr.bf16.mxu1 %v2812_v1 }
0x1063   :  { %v1525_v2 = vpop.permute.xlu0 %1524  ;;  %v1621_v4 = vpop.permute.xlu1 %1620 }
0x1064   :  { %v1530_v3 = vsel %vm597_vm8, %v1525_v2, 0  ;;  %v1626_v10 = vsel %vm597_vm8, %v1621_v4, 0 }
0x1065   :  { %2576 = vmatpush3.bf16.msra.mxu0 %v1530_v3 }
0x1066   :  { %v2745_v5 = vpop.eup %2744  ;;  %2587 = vmatprep.subr.bf16.mxu0 %v2812_v1 }
0x1067   :  { %v1470_v9 = vmul.f32 %v2745_v5, %v2737_v46 }
0x1068   :  { %2578 = vmatmul.mubr.msk.bf16.vlgmr.msra.gmra.mrb[32].mxu0 %vm543_vm7, %v1473_v6 }
0x1069   :  { %2588 = vmatpush3.bf16.msra.mxu0 %v1626_v10  ;;  %v1474_v14 = vpack.c.bf16 %v1470_v9, %v1470_v9  ;;  %2589 = vmatprep.mubr.msk.bf16.mxu0 %vm2813_vm1, %v2812_v1  ;;  %v2690_v10 = vld [vmem:[%s3404_s8 + $0x18] sm:$0xff]  }
0x106a   :  { %v2747_v16 = vpop.eup %2746  ;;  %2599 = vmatprep.subr.bf16.mxu0 %v2812_v1 }
0x106b   :  { %v1471_v17 = vmul.f32 %v2747_v16, %v2739_v49  ;;  %2584 = vmatmul.mubr.msk.bf16.vlgmr.msra.gmra.mrb[48].mxu1 %vm543_vm7, %v1474_v14 }
0x106c   :  { %2595 = vmatprep.mubr.msk.bf16.mxu1 %vm2813_vm1, %v2812_v1  ;;  %2594 = vmatpush3.bf16.msra.mxu1 %v2687_v19 }
0x106d   :  { %v1475_v7 = vpack.c.bf16 %v1471_v17, %v1471_v17  ;;  %2605 = vmatprep.subr.bf16.mxu1 %v2812_v1 }
0x1070   :  { %2590 = vmatmul.mubr.msk.bf16.vlgmr.msra.gmra.mrb[36].mxu0 %vm543_vm7, %v1475_v7 }
0x1071   :  { %2601 = vmatprep.mubr.msk.bf16.mxu0 %vm2813_vm1, %v2812_v1  ;;  %2600 = vmatpush3.bf16.msra.mxu0 %v2688_v20 }
0x1072   :  { %2613 = vmatprep.subr.bf16.mxu0 %v2812_v1 }
0x10c5   :  { %v1518_v21 = vpop.f32.mrb[44].mxu1 }
0x10c6   :  { %v2573_v22 = vpop.f32.mrb[45].mxu1 }
0x10c7   :  { %v1521_v25 = vpop.f32.mrb[46].mxu1  ;;  %v1814_v22 = vrot.slane %v3198_v26, %v3125_v48 }
0x10c8   :  { %v2574_v60 = vpop.f32.mrb[47].mxu1 }
0x113b   :  { %v1566_v27 = vpop.f32.mrb[32].mxu0 }
0x113c   :  { %v1673_v28 = vpack.c.bf16 %v1566_v27, %v1518_v21  ;;  %v2579_v29 = vpop.f32.mrb[33].mxu0 }
0x113d   :  { %v1569_v31 = vpop.f32.mrb[34].mxu0  ;;  %v1820_v29 = vrot.slane %v3198_v26, %v3130_v50 }
0x113e   :  { %v2580_v32 = vpop.f32.mrb[35].mxu0  ;;  %v1614_v33 = vpop.f32.mrb[48].mxu1  ;;  %2596 = vmatmul.mubr.msk.bf16.vlgmr.msra.gmra.mrb[52].mxu1 %vm308_vm6, %v1673_v28 }
0x113f   :  { %v2585_v34 = vpop.f32.mrb[49].mxu1  ;;  %2609 = vmatprep.mubr.msk.bf16.mxu1 %vm2813_vm1, %v2812_v1 }
0x1140   :  { %v1617_v35 = vpop.f32.mrb[50].mxu1 }
0x1141   :  { %v2586_v37 = vpop.f32.mrb[51].mxu1  ;;  %v2691_v35 = vld [vmem:[%s3405_s9 + $0x20] sm:$0xff]  }
0x1142   :  { %v2692_v37 = vld [vmem:[%s3405_s9 + $0x28] sm:$0xff]  }
0x1143   :  { %v1662_v30 = vpop.f32.mrb[36].mxu0 }
0x1144   :  { %v1730_v40 = vpack.c.bf16 %v1662_v30, %v1614_v33  ;;  %v2591_v11 = vpop.f32.mrb[37].mxu0  ;;  %v2693_v30 = vld [vmem:[%s3405_s9 + $0x30] sm:$0xff]  }
0x1145   :  { %v1665_v12 = vpop.f32.mrb[38].mxu0  ;;  %v1832_v11 = vrot.slane %v3198_v26, %v3154_v8 }
0x1146   :  { %v2592_v39 = vpop.f32.mrb[39].mxu0  ;;  %2602 = vmatmul.mubr.msk.bf16.vlgmr.msra.gmra.mrb[40].mxu0 %vm308_vm6, %v1730_v40  ;;  %v2694_v40 = vld [vmem:[%s3405_s9 + $0x38] sm:$0xff]  }
0x1147   :  { %2621 = vmatprep.mubr.msk.bf16.mxu0 %vm2813_vm1, %v2812_v1  ;;  %2614 = vmatpush3.bf16.msra.mxu0 %v2691_v35 }
0x1148   :  { %2615 = vmatprep.subr.bf16.mxu0 %v2812_v1 }
0x114b   :  { %2616 = vmatpush3.bf16.msra.mxu0 %v2692_v37 }
0x114c   :  { %2617 = vmatprep.subr.bf16.mxu0 %v2812_v1 }
0x114f   :  { %2618 = vmatpush3.bf16.msra.mxu0 %v2693_v30 }
0x1150   :  { %2619 = vmatprep.subr.bf16.mxu0 %v2812_v1 }
0x1153   :  { %2620 = vmatpush3.bf16.msra.mxu0 %v2694_v40 }
0x1154   :  { %2641 = vmatprep.subr.bf16.mxu0 %v2812_v1 }
0x1211   :  { %v1717_v55 = vpop.f32.mrb[52].mxu1 }
0x1212   :  { %v2597_v56 = vpop.f32.mrb[53].mxu1  ;;  %v1728_v46 = vadd.f32 %v1727_v44, %v1717_v55 }
0x1213   :  { %v1720_v43 = vpop.f32.mrb[54].mxu1 }
0x1214   :  { %v2598_v45 = vpop.f32.mrb[55].mxu1  ;;  %v1729_v49 = vadd.f32 %v1727_v44, %v1720_v43 }
0x1219   :  { %v1774_v47 = vpop.f32.mrb[40].mxu0 }
0x121a   :  { %v1781_v51 = vadd.f32 %v1774_v47, %v1728_v46  ;;  %v2603_v52 = vpop.f32.mrb[41].mxu0 }
0x121b   :  { %v1777_v53 = vpop.f32.mrb[42].mxu0 }
0x121c   :  { %v1782_v54 = vadd.f32 %v1777_v53, %v1729_v49  ;;  %v2604_v57 = vpop.f32.mrb[43].mxu0  ;;  %v1783_v61 = vadd.f32 %v1781_v51, %v3186_v23 }
0x121e   :  { %v1785_v62 = vsel %vm184_vm5, %v1783_v61, 0.0  ;;  %v1784_v42 = vadd.f32 %v1782_v54, %v3188_v24  ;;  %v2689_v24 = vld [vmem:[%s3404_s8 + $0x10] sm:$0xff]  }
0x121f   :  { %1786 = vadd.xlane.f32.xlu0 %v1785_v62  ;;  %2606 = vmatpush3.bf16.msra.mxu1 %v2689_v24 }
0x1220   :  { %v1788_v63 = vsel %vm184_vm5, %v1784_v42, 0.0  ;;  %2607 = vmatprep.subr.bf16.mxu1 %v2812_v1 }
0x1221   :  { %1789 = vadd.xlane.f32.xlu1 %v1788_v63 }
0x1223   :  { %2608 = vmatpush3.bf16.msra.mxu1 %v2690_v10 }
0x1224   :  { %2625 = vmatprep.subr.bf16.mxu1 %v2812_v1 }
0x12ac   :  { %v1787_v0 = vpop.xlane.xlu0 %1786 }
0x12ad   :  { %v1791_v41 = vmul.f32 0.03125, %v1787_v0 }
0x12ae   :  { %v1790_v36 = vpop.xlane.xlu1 %1789 }
0x12af   :  { %v1793_v2 = vsub.f32 %v1783_v61, %v1791_v41  ;;  %v1792_v3 = vmul.f32 0.03125, %v1790_v36 }
0x12b1   :  { %v1794_v4 = vsub.f32 %v1784_v42, %v1792_v3  ;;  %v1795_v5 = vmul.f32 %v1793_v2, %v1793_v2 }
0x12b3   :  { %v1797_v6 = vsel %vm184_vm5, %v1795_v5, 0.0  ;;  %v1796_v9 = vmul.f32 %v1794_v4, %v1794_v4  ;;  %v1920_v5 = vrot.slane %v3198_v26, %v3162_v38 }
0x12b4   :  { %1798 = vadd.xlane.f32.xlu0 %v1797_v6 }
0x12b5   :  { %v1800_v23 = vsel %vm184_vm5, %v1796_v9, 0.0 }
0x12b8   :  { %1801 = vadd.xlane.f32.xlu0 %v1800_v23 }
0x1341   :  { %v1799_v14 = vpop.xlane.xlu0 %1798 }
0x1342   :  { %v1803_v16 = vmul.f32 0.03125, %v1799_v14 }
0x1344   :  { %v1805_v17 = vadd.f32 1e-12, %v1803_v16 }
0x1345   :  { %v1802_v7 = vpop.xlane.xlu0 %1801 }
0x1346   :  { %2748 = vrsqrt.f32 %v1805_v17  ;;  %v1804_v19 = vmul.f32 0.03125, %v1802_v7 }
0x1348   :  { %v1806_v20 = vadd.f32 1e-12, %v1804_v19 }
0x134a   :  { %2750 = vrsqrt.f32 %v1806_v20 }
0x1350   :  { %v2749_v21 = vpop.eup %2748 }
0x1351   :  { %v1809_v25 = vmul.f32 %v2749_v21, %v1793_v2 }
0x1353   :  { %v1815_v27 = vmul.f32 %v1814_v22, %v1809_v25 }
0x1354   :  { %v2751_v60 = vpop.eup %2750 }
0x1355   :  { %v1810_v28 = vmul.f32 %v2751_v60, %v1794_v4  ;;  %v1821_v32 = vadd.f32 %v1820_v29, %v1815_v27 }
0x1357   :  { %v1816_v31 = vmul.f32 %v1814_v22, %v1810_v28 }
0x1359   :  { %v1822_v33 = vadd.f32 %v1820_v29, %v1816_v31 }
0x135b   :  { %v1823_v34 = vpack.c.bf16 %v1822_v33, %v1821_v32 }
0x135d   :  { %2610 = vmatmul.mubr.msk.bf16.vlgmr.msra.gmra.mrb[56].mxu1 %vm184_vm5, %v1823_v34  ;;  %v2696_v34 = vld [vmem:[%s3407_s11 + $0x8] sm:$0xff]  }
0x135e   :  { %2629 = vmatprep.mubr.msk.bf16.mxu1 %vm2813_vm1, %v2812_v1 }
0x1430   :  { %v1882_v12 = vpop.f32.mrb[56].mxu1 }
0x1431   :  { %v1883_v39 = vadd.f32 %v1882_v12, %v1832_v11  ;;  %v2611_v55 = vpop.f32.mrb[57].mxu1 }
0x1432   :  { %v1885_v56 = vpop.f32.mrb[58].mxu1 }
0x1433   :  { %v1889_v43 = vmul.f32 %v1883_v39, %v1883_v39  ;;  %v1886_v44 = vadd.f32 %v1885_v56, %v1832_v11  ;;  %v2612_v45 = vpop.f32.mrb[59].mxu1  ;;  %v2026_v56 = vrot.slane %v3198_v26, %v1140_v15  ;;  %v2699_v15 = vld [vmem:[%s3409_s13] sm:$0xff]  }
0x1435   :  { %v1891_v46 = vmul.f32 %v1889_v43, %v1883_v39  ;;  %v1890_v47 = vmul.f32 %v1886_v44, %v1886_v44 }
0x1437   :  { %v1893_v49 = vmul.f32 0.044715, %v1891_v46  ;;  %v1892_v51 = vmul.f32 %v1890_v47, %v1886_v44 }
0x1439   :  { %v1895_v52 = vadd.f32 %v1893_v49, %v1883_v39  ;;  %v1894_v53 = vmul.f32 0.044715, %v1892_v51 }
0x143b   :  { %v1897_v54 = vmul.f32 0.7978846, %v1895_v52  ;;  %v1896_v57 = vadd.f32 %v1894_v53, %v1886_v44 }
0x143d   :  { %2752 = vtanh.f32 %v1897_v54  ;;  %v1898_v61 = vmul.f32 0.7978846, %v1896_v57 }
0x143f   :  { %2754 = vtanh.f32 %v1898_v61 }
0x1447   :  { %v2753_v62 = vpop.eup %2752 }
0x1448   :  { %v1901_v42 = vadd.f32 1.0, %v2753_v62 }
0x1449   :  { %v2755_v63 = vpop.eup %2754 }
0x144a   :  { %v1903_v0 = vmul.f32 0.5, %v1901_v42  ;;  %v1902_v41 = vadd.f32 1.0, %v2755_v63  ;;  %v2168_v42 = vld [vmem:[%s3398_s2] sm:$0x1]  ;;  %s2818_s2 = smov [#allocation5]  }
0x144b   :  { %v2029_v63 = vld [vmem:[%s3410_s14] sm:$0xff] }
0x144c   :  { %v1904_v36 = vmul.f32 0.5, %v1902_v41  ;;  %v1905_v2 = vmul.f32 %v1903_v0, %v1883_v39  ;;  %v2020_v39 = vrot.slane %v3198_v26, %v1134_v13  ;;  %v2698_v26 = vld [vmem:[%s3408_s12 + $0x8] sm:$0xff]   ;;  %v2039_v0 = vrot.slane %v2029_v63, %v2994_v59  ;;  %s2259_s12 = sshll.u32 %s2818_s2, 4  ;;  %s2260_s12 = int_to_ptr.vmem [resolvable:$true] %s2259_s12 }
0x144d   :  { %s2784_s13 = scalar_lea.vmem %s2260_s12, 32  ;;  %p2789_p9 = scmp.lt.s32.totalorder %s2260_s12, %s2260_s12 }
0x144e   :  { %v1906_v3 = vmul.f32 %v1904_v36, %v1886_v44  ;;  %p2785_p8 = scmp.ne.s32.totalorder %s2260_s12, %s2784_s13  ;;  %p2790_p10 = scmp.lt.s32.totalorder %s2784_s13, %s2784_s13 }
0x1450   :  { %v1907_v4 = vpack.c.bf16 %v1906_v3, %v1905_v2  ;;  %p2791_p11 = por %p2790_p10, %p2789_p9 }
0x1452   :  { %2622 = vmatmul.mubr.msk.bf16.vlgmr.msra.gmra.mrb[44].mxu0 %vm1059_vm9, %v1907_v4  ;;  %p2792_p12 = pnand %p2791_p11, %p2785_p8 }
0x1453   :  { %2643 = vmatprep.mubr.msk.bf16.mxu0 %vm2813_vm1, %v2812_v1  ;;  %2642 = vmatpush3.bf16.msra.mxu0 %v2699_v15 }
0x145a   :  { %2644 = vmatmul.mubr.msk.bf16.vlgmr.msra.gmra.mrb[48].mxu0 %vm308_vm6, %v2168_v42 }
0x1525   :  { %v1982_v6 = vpop.f32.mrb[44].mxu0 }
0x1526   :  { %v1983_v9 = vadd.f32 %v1982_v6, %v1920_v5  ;;  %v2623_v23 = vpop.f32.mrb[45].mxu0 }
0x1527   :  { %v1985_v24 = vpop.f32.mrb[46].mxu0  ;;  %v2174_v23 = vrot.slane %v2029_v63, %v3154_v8 }
0x1528   :  { %v1986_v10 = vadd.f32 %v1985_v24, %v1920_v5  ;;  %v2624_v14 = vpop.f32.mrb[47].mxu0  ;;  %v1989_v16 = vadd.f32 %v1983_v9, %v1821_v32 }
0x152a   :  { %v1991_v17 = vsel %vm184_vm5, %v1989_v16, 0.0  ;;  %v1990_v7 = vadd.f32 %v1986_v10, %v1822_v33  ;;  %v2695_v33 = vld [vmem:[%s3407_s11] sm:$0xff]  }
0x152b   :  { %1992 = vadd.xlane.f32.xlu0 %v1991_v17  ;;  %2626 = vmatpush3.bf16.msra.mxu1 %v2695_v33 }
0x152c   :  { %v1994_v19 = vsel %vm184_vm5, %v1990_v7, 0.0  ;;  %2627 = vmatprep.subr.bf16.mxu1 %v2812_v1 }
0x152d   :  { %1995 = vadd.xlane.f32.xlu1 %v1994_v19  ;;  %v2218_v6 = vpop.f32.mrb[48].mxu0  ;;  %v2227_v19 = vrot.slane %v2029_v63, %v3162_v38 }
0x152e   :  { %v2645_v9 = vpop.f32.mrb[49].mxu0  ;;  %v2219_v14 = vadd.f32 %v2218_v6, %v2174_v23 }
0x152f   :  { %2628 = vmatpush3.bf16.msra.mxu1 %v2696_v34  ;;  %v2221_v24 = vpop.f32.mrb[50].mxu0 }
0x1530   :  { %2633 = vmatprep.subr.bf16.mxu1 %v2812_v1  ;;  %v2646_v10 = vpop.f32.mrb[51].mxu0 }
0x15b8   :  { %v1993_v20 = vpop.xlane.xlu0 %1992 }
0x15b9   :  { %v1997_v21 = vmul.f32 0.03125, %v1993_v20 }
0x15ba   :  { %v1996_v22 = vpop.xlane.xlu1 %1995 }
0x15bb   :  { %v1999_v25 = vsub.f32 %v1989_v16, %v1997_v21  ;;  %v1998_v60 = vmul.f32 0.03125, %v1996_v22  ;;  %v2236_v16 = vrot.slane %v2029_v63, %v3125_v48  ;;  %v2245_v48 = vrot.slane %v2029_v63, %v3130_v50 }
0x15bd   :  { %v2000_v27 = vsub.f32 %v1990_v7, %v1998_v60  ;;  %v2001_v28 = vmul.f32 %v1999_v25, %v1999_v25  ;;  %v2237_v59 = vmul.f32 %v2236_v16, %v2219_v14  ;;  %v2112_v7 = vrot.slane %v2029_v63, %v3106_v18 }
0x15bf   :  { %v2003_v29 = vsel %vm184_vm5, %v2001_v28, 0.0  ;;  %v2002_v31 = vmul.f32 %v2000_v27, %v2000_v27  ;;  %v2238_v17 = vsel %vm137_vm0, %v2237_v59, 0.0 }
0x15c0   :  { %2004 = vadd.xlane.f32.xlu0 %v2003_v29 }
0x15c1   :  { %v2006_v32 = vsel %vm184_vm5, %v2002_v31, 0.0 }
0x15c2   :  { %2007 = vadd.xlane.f32.xlu1 %v2006_v32 }
0x15c4   :  { %2239 = vadd.xlane.f32.xlu0 %v2238_v17 }
0x164d   :  { %v2005_v35 = vpop.xlane.xlu0 %2004 }
0x164e   :  { %v2009_v37 = vmul.f32 0.03125, %v2005_v35 }
0x164f   :  { %v2008_v30 = vpop.xlane.xlu1 %2007 }
0x1650   :  { %v2011_v40 = vadd.f32 1e-12, %v2009_v37  ;;  %v2010_v11 = vmul.f32 0.03125, %v2008_v30 }
0x1651   :  { %v2240_v28 = vpop.xlane.xlu0 %2239 }
0x1652   :  { %2756 = vrsqrt.f32 %v2011_v40  ;;  %v2012_v12 = vadd.f32 1e-12, %v2010_v11 }
0x1654   :  { %2758 = vrsqrt.f32 %v2012_v12 }
0x165c   :  { %v2757_v55 = vpop.eup %2756 }
0x165d   :  { %v2015_v43 = vmul.f32 %v2757_v55, %v1999_v25 }
0x165e   :  { %v2759_v44 = vpop.eup %2758 }
0x165f   :  { %v2021_v45 = vmul.f32 %v2020_v39, %v2015_v43  ;;  %v2016_v46 = vmul.f32 %v2759_v44, %v2000_v27 }
0x1661   :  { %v2027_v47 = vadd.f32 %v2026_v56, %v2021_v45  ;;  %v2022_v49 = vmul.f32 %v2020_v39, %v2016_v46 }
0x1663   :  { %v2028_v51 = vadd.f32 %v2026_v56, %v2022_v49  ;;  %v2030_v52 = vpack.c.bf16 %v2027_v47, %v2027_v47 }
0x1665   :  { %v2031_v53 = vpack.c.bf16 %v2028_v51, %v2028_v51  ;;  %v2042_v57 = vunpack.c.l.b16 %v2030_v52 }
0x1667   :  { %v2043_v54 = vunpack.c.l.b16 %v2031_v53 }
0x1669   :  { %v2044_v61 = vrot.slane %v2043_v54, 7 }
0x166b   :  { %v2046_v62 = vsel %vm2045_vm10, %v2044_v61, %v2042_v57 }
0x166c   :  { %v2047_v13 = vpack.c.b16 %v2046_v62, %v2046_v62 }
0x166e   :  { %2630 = vmatmul.mubr.msk.bf16.vlgmr.msra.gmra.mrb[60].mxu1 %vm184_vm5, %v2047_v13 }
0x166f   :  { %2637 = vmatprep.mubr.msk.bf16.mxu1 %vm2813_vm1, %v2812_v1  ;;  %2634 = vmatpush3.bf16.msra.mxu1 %v2697_v58 }
0x1670   :  { %2635 = vmatprep.subr.bf16.mxu1 %v2812_v1 }
0x1673   :  { %2636 = vmatpush3.bf16.msra.mxu1 %v2698_v26 }
0x1741   :  { %v2097_v41 = vpop.f32.mrb[60].mxu1 }
0x1742   :  { %v2098_v1 = vadd.f32 %v2097_v41, %v2039_v0  ;;  %v2631_v36 = vpop.f32.mrb[61].mxu1 }
0x1743   :  { %v2100_v2 = vpop.f32.mrb[62].mxu1 }
0x1744   :  { %2760 = vtanh.f32 %v2098_v1  ;;  %v2632_v3 = vpop.f32.mrb[63].mxu1 }
0x174e   :  { %v2761_v4 = vpop.eup %2760 }
0x174f   :  { %v2104_v5 = vpack.c.bf16 %v2761_v4, %v2761_v4 }
0x1751   :  { %2638 = vmatmul.mubr.msk.bf16.vlgmr.msra.gmra.mrb[64].mxu1 %vm184_vm5, %v2104_v5 }
0x1824   :  { %v2162_v20 = vpop.f32.mrb[64].mxu1 }
0x1825   :  { %v2163_v21 = vadd.f32 %v2162_v20, %v2112_v7  ;;  %v2639_v22 = vpop.f32.mrb[65].mxu1 }
0x1826   :  { %v2165_v25 = vpop.f32.mrb[66].mxu1 }
0x1827   :  { %v2640_v60 = vpop.f32.mrb[67].mxu1  ;;  %v2228_v8 = vmul.f32 %v2227_v19, %v2163_v21 }
0x1829   :  { %v2230_v27 = vsel %vm2229_vm11, %v2228_v8, 0.0 }
0x182a   :  { %2231 = vadd.xlane.f32.xlu1 %v2230_v27 }
0x18b7   :  { %v2232_v29 = vpop.xlane.xlu1 %2231 }
0x18b8   :  { %v2241_v31 = vadd.f32 %v2240_v28, %v2232_v29 }
0x18ba   :  { %v2246_v32 = vadd.f32 %v2245_v48, %v2241_v31 }
0x18bc   :  { %2249 = vperm.xlu1 %2667, %v2246_v32  }
0x193b   :  { %v2250_v18 = vpop.permute.xlu1 %2249 }
0x193c   :  { %2252 = vst [vmem:[#allocation5] sm:$0x3] %v2250_v18 }
0x193d   :  { %2795 = shalt.err (!%p2792_p12)
}
0x193e   :  { %s2796_s16 = scalar_lea.hbm %s3411_s15, 32 }
0x193f   :  { %p2797_p13 = scmp.ne.s32.totalorder %s3411_s15, %s2796_s16  ;;  %p2800_p0 = scmp.lt.u32.totalorder %s2796_s16, %s3411_s15 }
0x1941   :  { %p2802_p1 = pnand %p2800_p0, %p2797_p13 }
0x1943   :  { %2805 = shalt.err (!%p2802_p1)
}
0x1944   :  { %2262 = dma.vmem_to_hbm [thread:$0]  %s2260_s12, 32, %s3411_s15, [#allocation4]  }
0x1945   :  { %2808 = dma.done.wait [#allocation4], 32  }
0x1946   :  { %2809 = vsyncadd [#allocation4], 4294967264 }
0x1947   :  { %2266 = vsyncpa [#allocation3], 1 }
0x1948   :  { %2267 = vsyncpa [#allocation4], 1 }

</bundles_post_ra>
